<compile_context>
chip_gen: v5e
topology: v5e:2x2
jax: 0.10.0
libtpu: 0.0.40
codegen_flags: <defaults>
</compile_context>

<pallas_src>
import functools

import jax
import jax.numpy as jnp
from jax import lax
from jax.experimental import pallas as pl
from jax.experimental.pallas import tpu as pltpu


COMPUTE_DTYPE = jnp.bfloat16   # MXU-native matmul inputs; accumulation stays f32.


def _pick_tile(dim, max_tile, mults):
    """Largest divisor of `dim` <= max_tile that is a multiple of one of `mults`
    (tried in order); falls back to the full dim (always legal via the full-dim
    exemption from the (8,128) rule)."""
    if dim <= max_tile:
        return dim
    for mult in mults:
        t = (max_tile // mult) * mult
        while t > 0:
            if dim % t == 0:
                return t
            t -= mult
    return dim


def _maybe_split(dim, tile):
    """Halve an M/Q tile when its grid axis would otherwise have a single step, so
    v7x's two TensorCores both get parallel work (keep a multiple of 16 sublanes)."""
    if dim // tile >= 2 or tile < 32:
        return tile
    half = tile // 2
    if dim % half == 0 and half % 16 == 0:
        return half
    return tile


# ---------------------------------------------------------------------------
# Fused linear: y = x @ w + b        x:(M,K)  w:(K,N)  b:(N,)
# ---------------------------------------------------------------------------
def _linear_kernel(x_ref, w_ref, b_ref, o_ref, acc_ref):
    @pl.when(pl.program_id(2) == 0)
    def _():
        acc_ref[...] = jnp.zeros_like(acc_ref)

    acc_ref[...] += jnp.dot(x_ref[...], w_ref[...],
                            preferred_element_type=jnp.float32)

    @pl.when(pl.program_id(2) == pl.num_programs(2) - 1)
    def _():
        o_ref[...] = (acc_ref[...] + b_ref[...].astype(jnp.float32)
                      ).astype(o_ref.dtype)


def linear_pallas(x, w, b, out_dtype):
    M, K = x.shape
    K2, N = w.shape
    assert K == K2
    if b is None:
        b = jnp.zeros((N,), jnp.float32)
    b2 = jnp.asarray(b, jnp.float32).reshape(1, N)

    x = x.astype(COMPUTE_DTYPE)
    w = w.astype(COMPUTE_DTYPE)

    tm = _pick_tile(M, 512, (16, 8))
    tn = _pick_tile(N, 256, (128,))
    tk = _pick_tile(K, 512, (128,))
    if (M // tm) * (N // tn) < 2:          # keep >=2 parallel steps for v7x megacore
        tm = _maybe_split(M, tm)

    return pl.pallas_call(
        _linear_kernel,
        out_shape=jax.ShapeDtypeStruct((M, N), out_dtype),
        grid_spec=pltpu.PrefetchScalarGridSpec(
            num_scalar_prefetch=0,
            grid=(M // tm, N // tn, K // tk),
            in_specs=[
                pl.BlockSpec((tm, tk), lambda i, j, k: (i, k)),
                pl.BlockSpec((tk, tn), lambda i, j, k: (k, j)),
                pl.BlockSpec((1, tn), lambda i, j, k: (0, j)),
            ],
            out_specs=pl.BlockSpec((tm, tn), lambda i, j, k: (i, j)),
            scratch_shapes=[pltpu.VMEM((tm, tn), jnp.float32)],
        ),
        compiler_params=pltpu.CompilerParams(
            dimension_semantics=("parallel", "parallel", "arbitrary")),
    )(x, w, b2)


# ---------------------------------------------------------------------------
# Fused linear + LayerNorm:  ln(x @ w + b) * gamma + beta   (N untiled, <= 512)
# Used for the sr-conv (conv collapsed into one K = sr*sr*C contraction) so the
# full output row sits in the f32 accumulator when the last K step finishes.
# ---------------------------------------------------------------------------
def _linear_ln_kernel(x_ref, w_ref, b_ref, g_ref, bb_ref, o_ref, acc_ref, *, eps):
    @pl.when(pl.program_id(1) == 0)
    def _():
        acc_ref[...] = jnp.zeros_like(acc_ref)

    acc_ref[...] += jnp.dot(x_ref[...], w_ref[...],
                            preferred_element_type=jnp.float32)

    @pl.when(pl.program_id(1) == pl.num_programs(1) - 1)
    def _():
        y = acc_ref[...] + b_ref[...].astype(jnp.float32)       # (tm, N) f32
        mu = jnp.mean(y, axis=-1, keepdims=True)
        yc = y - mu
        var = jnp.mean(yc * yc, axis=-1, keepdims=True)
        inv = lax.rsqrt(var + eps)
        y = yc * inv * g_ref[...].astype(jnp.float32) + bb_ref[...].astype(jnp.float32)
        o_ref[...] = y.astype(o_ref.dtype)


def linear_ln_pallas(x, w, b, gamma, beta, out_dtype, eps=1e-5):
    M, K = x.shape
    K2, N = w.shape
    assert K == K2
    b2 = jnp.asarray(b, jnp.float32).reshape(1, N)
    g2 = jnp.asarray(gamma, jnp.float32).reshape(1, N)
    bb2 = jnp.asarray(beta, jnp.float32).reshape(1, N)

    x = x.astype(COMPUTE_DTYPE)
    w = w.astype(COMPUTE_DTYPE)

    tm = _pick_tile(M, 512, (16, 8))
    tk = _pick_tile(K, 512, (128,))
    if M // tm < 2:
        tm = _maybe_split(M, tm)

    return pl.pallas_call(
        functools.partial(_linear_ln_kernel, eps=eps),
        out_shape=jax.ShapeDtypeStruct((M, N), out_dtype),
        grid_spec=pltpu.PrefetchScalarGridSpec(
            num_scalar_prefetch=0,
            grid=(M // tm, K // tk),
            in_specs=[
                pl.BlockSpec((tm, tk), lambda i, k: (i, k)),
                pl.BlockSpec((tk, N), lambda i, k: (k, 0)),
                pl.BlockSpec((1, N), lambda i, k: (0, 0)),
                pl.BlockSpec((1, N), lambda i, k: (0, 0)),
                pl.BlockSpec((1, N), lambda i, k: (0, 0)),
            ],
            out_specs=pl.BlockSpec((tm, N), lambda i, k: (i, 0)),
            scratch_shapes=[pltpu.VMEM((tm, N), jnp.float32)],
        ),
        compiler_params=pltpu.CompilerParams(
            dimension_semantics=("parallel", "arbitrary")),
    )(x, w, b2, g2, bb2)


# ---------------------------------------------------------------------------
# Multi-head attention with the output projection fused.
#   q_ref : (1, TQ, CQ)   q columns start at q_off (head-major, D wide each)
#   kv_ref: (1, Nkv, CKV) K columns start at k_off, V columns at v_off
#   proj_w (C, C) bf16 and proj_b (1, C) f32 stay resident (constant index_map).
# softmax scale is pre-folded into the q projection weights.
# ---------------------------------------------------------------------------
def _attention_kernel(q_ref, kv_ref, pw_ref, pb_ref, o_ref, acc_ref, *,
                      num_heads, head_dim, q_off, k_off, v_off):
    D = head_dim
    q = q_ref[0]                       # (TQ, CQ)  bf16
    kv = kv_ref[0]                     # (Nkv, CKV) bf16
    for h in range(num_heads):
        qh = q[:, q_off + h * D:q_off + (h + 1) * D]          # (TQ, D)
        kh = kv[:, k_off + h * D:k_off + (h + 1) * D]         # (Nkv, D)
        vh = kv[:, v_off + h * D:v_off + (h + 1) * D]         # (Nkv, D)
        s = lax.dot_general(qh, kh, (((1,), (1,)), ((), ())),
                            preferred_element_type=jnp.float32)
        s = s - jnp.max(s, axis=-1, keepdims=True)
        p = jnp.exp(s)
        p = p * pl.reciprocal(jnp.sum(p, axis=-1, keepdims=True), approx=True)
        # one head live at a time; result lands in its lane slice of the scratch
        acc_ref[:, h * D:(h + 1) * D] = jnp.dot(p.astype(kv.dtype), vh,
                                                preferred_element_type=jnp.float32)
    attn = acc_ref[...].astype(COMPUTE_DTYPE)                 # (TQ, C)
    out = jnp.dot(attn, pw_ref[...], preferred_element_type=jnp.float32)
    out = out + pb_ref[...].astype(jnp.float32)
    o_ref[...] = out[None].astype(o_ref.dtype)                # lane-dense (1, TQ, C)


def attention_pallas(q, kv, proj_w, proj_b, *, num_heads, q_off, k_off, v_off,
                     out_dtype):
    B, N, CQ = q.shape
    _, Nkv, CKV = kv.shape
    C = proj_w.shape[0]
    D = C // num_heads

    tq = _pick_tile(N, 256, (16, 8))
    if B * (N // tq) < 2:              # keep >=2 parallel steps for v7x megacore
        tq = _maybe_split(N, tq)

    kernel = functools.partial(_attention_kernel, num_heads=num_heads, head_dim=D,
                               q_off=q_off, k_off=k_off, v_off=v_off)
    pb2 = jnp.asarray(proj_b, jnp.float32).reshape(1, C)

    return pl.pallas_call(
        kernel,
        out_shape=jax.ShapeDtypeStruct((B, N, C), out_dtype),
        grid_spec=pltpu.PrefetchScalarGridSpec(
            num_scalar_prefetch=0,
            grid=(B, N // tq),
            in_specs=[
                pl.BlockSpec((1, tq, CQ), lambda b, i: (b, i, 0)),
                pl.BlockSpec((1, Nkv, CKV), lambda b, i: (b, 0, 0)),
                pl.BlockSpec((C, C), lambda b, i: (0, 0)),       # resident proj_w
                pl.BlockSpec((1, C), lambda b, i: (0, 0)),       # resident proj_b
            ],
            out_specs=pl.BlockSpec((1, tq, C), lambda b, i: (b, i, 0)),
            scratch_shapes=[pltpu.VMEM((tq, C), jnp.float32)],
        ),
        compiler_params=pltpu.CompilerParams(
            dimension_semantics=("parallel", "parallel")),
    )(q.astype(COMPUTE_DTYPE), kv.astype(COMPUTE_DTYPE),
      proj_w.astype(COMPUTE_DTYPE), pb2)


# ---------------------------------------------------------------------------
# Parameter preparation (hoisted out of the hot path): transpose Linear weights to
# (in, out), fold the softmax scale into q, fuse q|kv weights when sr_ratio == 1,
# reshape the sr-conv weight to its im2col (S*S*Cin, Cout) form, cast MXU inputs
# to bf16.
# ---------------------------------------------------------------------------
def prepare_params(p, num_heads, sr_ratio):
    q_w = jnp.asarray(p["q_w"], jnp.float32)           # (C, C) torch (out, in)
    C = q_w.shape[1]
    scale = (C // num_heads) ** -0.5

    def _bias(b, n):
        return jnp.zeros((n,), jnp.float32) if b is None else jnp.asarray(b, jnp.float32)

    q_wT = (q_w * scale).T                              # scale folded into weights
    q_b = _bias(p.get("q_b"), C) * scale
    kv_wT = jnp.asarray(p["kv_w"], jnp.float32).T       # (C, 2C)
    kv_b = _bias(p.get("kv_b"), 2 * C)

    out = {
        "proj_w": jnp.asarray(p["proj_w"], jnp.float32).T.astype(COMPUTE_DTYPE),
        "proj_b": jnp.asarray(p["proj_b"], jnp.float32),
    }
    if sr_ratio > 1:
        out["q_w"] = q_wT.astype(COMPUTE_DTYPE)
        out["q_b"] = q_b
        out["kv_w"] = kv_wT.astype(COMPUTE_DTYPE)
        out["kv_b"] = kv_b
        S = sr_ratio
        # torch OIHW -> (kh, kw, cin, cout) -> (S*S*Cin, Cout), matching im2col order.
        out["sr_w"] = jnp.transpose(jnp.asarray(p["sr_w"], jnp.float32),
                                    (2, 3, 1, 0)).reshape(S * S * C, -1
                                                          ).astype(COMPUTE_DTYPE)
        out["sr_b"] = jnp.asarray(p["sr_b"], jnp.float32)
        out["norm_w"] = jnp.asarray(p["norm_w"], jnp.float32)
        out["norm_b"] = jnp.asarray(p["norm_b"], jnp.float32)
    else:
        # single 3C-wide projection: cols [0,C)=q(scaled), [C,2C)=K, [2C,3C)=V
        out["qkv_w"] = jnp.concatenate([q_wT, kv_wT], axis=1).astype(COMPUTE_DTYPE)
        out["qkv_b"] = jnp.concatenate([q_b, kv_b], axis=0)
    return out


def pvt_attention_forward(x, H, W, params, *, num_heads, sr_ratio):
    """x: (B, N, C) with N == H*W.  params: output of prepare_params."""
    B, N, C = x.shape
    assert N == H * W

    x2d = x.astype(COMPUTE_DTYPE).reshape(B * N, C)

    if sr_ratio > 1:
        # ---- q projection (scale pre-folded) ------------------------------
        q = linear_pallas(x2d, params["q_w"], params["q_b"],
                          COMPUTE_DTYPE).reshape(B, N, C)

        # ---- spatial-reduction conv (as one matmul) + fused LayerNorm ------
        S = sr_ratio
        xi = x.reshape(B, H, W, C)
        # circular pad along W (F.pad(..., (1,1,0,0), mode='circular'))
        xp = jnp.concatenate([xi[:, :, -1:, :], xi, xi[:, :, :1, :]], axis=2)
        # zero pad along H (Conv2d padding=(1, 0))
        xp = jnp.pad(xp, ((0, 0), (1, 1), (0, 0), (0, 0)))
        Hp, Wp = H + 2, W + 2
        Ho = (Hp - S) // S + 1
        Wo = (Wp - S) // S + 1
        # stride == kernel_size  =>  im2col is a duplication-free relayout.
        xp = xp[:, :Ho * S, :Wo * S, :]
        patches = xp.reshape(B, Ho, S, Wo, S, C).transpose(0, 1, 3, 2, 4, 5)
        patches = patches.reshape(B * Ho * Wo, S * S * C).astype(COMPUTE_DTYPE)
        kv_in = linear_ln_pallas(patches, params["sr_w"], params["sr_b"],
                                 params["norm_w"], params["norm_b"], COMPUTE_DTYPE)
        Nkv = Ho * Wo

        # ---- kv projection --------------------------------------------------
        kv = linear_pallas(kv_in, params["kv_w"], params["kv_b"],
                           COMPUTE_DTYPE).reshape(B, Nkv, 2 * C)

        # ---- attention + fused output projection ----------------------------
        out = attention_pallas(q, kv, params["proj_w"], params["proj_b"],
                               num_heads=num_heads, q_off=0, k_off=0, v_off=C,
                               out_dtype=jnp.float32)
    else:
        # ---- fused q|kv projection (x read once, 3C-wide lane-dense out) ----
        qkv = linear_pallas(x2d, params["qkv_w"], params["qkv_b"],
                            COMPUTE_DTYPE).reshape(B, N, 3 * C)
        # same array fed twice with different BlockSpecs; no wrapper slicing.
        out = attention_pallas(qkv, qkv, params["proj_w"], params["proj_b"],
                               num_heads=num_heads, q_off=0, k_off=C, v_off=2 * C,
                               out_dtype=jnp.float32)
    return out


# ---------------------------------------------------------------------------
# Pure-JAX f32 reference mirroring the PyTorch forward (for correctness check).
# ---------------------------------------------------------------------------
def attention_ref(x, H, W, p, *, num_heads, sr_ratio, eps=1e-5):
    B, N, C = x.shape
    D = C // num_heads
    scale = D ** -0.5

    def lin(t, w, b):
        y = t @ w.T
        return y if b is None else y + b

    q = lin(x, p["q_w"], p.get("q_b")).reshape(B, N, num_heads, D).transpose(0, 2, 1, 3)

    if sr_ratio > 1:
        S = sr_ratio
        xi = x.reshape(B, H, W, C)
        xp = jnp.concatenate([xi[:, :, -1:, :], xi, xi[:, :, :1, :]], axis=2)
        xp = jnp.pad(xp, ((0, 0), (1, 1), (0, 0), (0, 0)))
        conv = lax.conv_general_dilated(
            xp, jnp.transpose(p["sr_w"], (2, 3, 1, 0)),
            window_strides=(S, S), padding="VALID",
            dimension_numbers=("NHWC", "HWIO", "NHWC")) + p["sr_b"]
        Ho, Wo = conv.shape[1], conv.shape[2]
        x_ = conv.reshape(B, Ho * Wo, C)
        mu = jnp.mean(x_, axis=-1, keepdims=True)
        var = jnp.mean((x_ - mu) ** 2, axis=-1, keepdims=True)
        x_ = (x_ - mu) / jnp.sqrt(var + eps) * p["norm_w"] + p["norm_b"]
        kv_in = x_
    else:
        kv_in = x

    kv = lin(kv_in, p["kv_w"], p.get("kv_b"))
    Nkv = kv.shape[1]
    kv = kv.reshape(B, Nkv, 2, num_heads, D).transpose(2, 0, 3, 1, 4)
    k, v = kv[0], kv[1]
    attn = jnp.einsum("bhqd,bhkd->bhqk", q, k) * scale
    attn = jax.nn.softmax(attn, axis=-1)
    out = jnp.einsum("bhqk,bhkd->bhqd", attn, v)
    out = out.transpose(0, 2, 1, 3).reshape(B, N, C)
    return out @ p["proj_w"].T + p["proj_b"]


if __name__ == "__main__":
    B, C, H, W = 2, 64, 8, 8
    num_heads = 2
    N = H * W

    key = jax.random.PRNGKey(0)
    keys = jax.random.split(key, 12)
    x = jax.random.normal(keys[0], (B, N, C), dtype=jnp.float32)

    def init_linear(kw, kb, out_dim, in_dim):
        w = jax.random.normal(kw, (out_dim, in_dim), jnp.float32) * 0.05
        b = jax.random.normal(kb, (out_dim,), jnp.float32) * 0.02
        return w, b

    q_w, q_b = init_linear(keys[1], keys[2], C, C)          # qkv_bias=True
    kv_w, kv_b = init_linear(keys[3], keys[4], 2 * C, C)
    proj_w, proj_b = init_linear(keys[5], keys[6], C, C)

    for sr_ratio in (2, 1):                                  # exercise both branches
        torch_params = {
            "q_w": q_w, "q_b": q_b,
            "kv_w": kv_w, "kv_b": kv_b,
            "proj_w": proj_w, "proj_b": proj_b,
        }
        if sr_ratio > 1:
            S = sr_ratio
            torch_params["sr_w"] = jax.random.normal(keys[7], (C, C, S, S), jnp.float32) * 0.05
            torch_params["sr_b"] = jax.random.normal(keys[8], (C,), jnp.float32) * 0.02
            torch_params["norm_w"] = 1.0 + 0.1 * jax.random.normal(keys[9], (C,), jnp.float32)
            torch_params["norm_b"] = 0.05 * jax.random.normal(keys[10], (C,), jnp.float32)

        prepared = prepare_params(torch_params, num_heads, sr_ratio)
        fwd = jax.jit(
            functools.partial(pvt_attention_forward,
                              num_heads=num_heads, sr_ratio=sr_ratio),
            static_argnums=(1, 2))
        out = jax.block_until_ready(fwd(x, H, W, prepared))
        ref = attention_ref(x, H, W, torch_params,
                            num_heads=num_heads, sr_ratio=sr_ratio)

        assert out.shape == (B, N, C)
        assert jnp.allclose(out, ref, atol=2e-2, rtol=2e-2), \
            float(jnp.max(jnp.abs(out - ref)))

    print("KERNEL_OK")
</pallas_src>

<mosaic_0001>
module attributes {stable_mosaic.version = 11 : i64} {
  func.func @_linear_kernel(%arg0: i32, %arg1: i32, %arg2: i32, %arg3: memref<50x64xbf16, #tpu.memory_space<vmem>>, %arg4: memref<64x128xbf16, #tpu.memory_space<vmem>>, %arg5: memref<1x128xf32, #tpu.memory_space<vmem>>, %arg6: memref<50x128xbf16, #tpu.memory_space<vmem>>, %arg7: memref<50x128xf32, #tpu.memory_space<vmem>>) attributes {dimension_semantics = [#tpu.dimension_semantics<parallel>, #tpu.dimension_semantics<parallel>, #tpu.dimension_semantics<arbitrary>], iteration_bounds = array<i64: 1, 1, 1>, scalar_prefetch = 0 : i64, scratch_operands = 1 : i64, tpu.core_type = #tpu.core_type<tc>, window_params = [{transform_indices = @transform_0, window_bounds = array<i64: 50, 64>}, {transform_indices = @transform_1, window_bounds = array<i64: 64, 128>}, {transform_indices = @transform_2, window_bounds = array<i64: 1, 128>}, {transform_indices = @transform_3, window_bounds = array<i64: 50, 128>}]} {
    %c0_i32 = arith.constant 0 : i32
    %0 = arith.cmpi eq, %arg2, %c0_i32 : i32
    %1 = arith.extui %0 : i1 to i32
    %c0_i32_0 = arith.constant 0 : i32
    %2 = arith.cmpi ne, %1, %c0_i32_0 : i32
    scf.if %2 {
      %cst_10 = arith.constant 0.000000e+00 : f32
      %12 = vector.broadcast %cst_10 : f32 to vector<50x128xf32>
      %c0_11 = arith.constant 0 : index
      %c0_12 = arith.constant 0 : index
      %13 = vector.load %arg7[%c0_11, %c0_12] : memref<50x128xf32, #tpu.memory_space<vmem>>, vector<50x128xf32>
      tpu.vector_store %arg7[%c0_11, %c0_12], %12 {strides = array<i32>} : memref<50x128xf32, #tpu.memory_space<vmem>>, vector<50x128xf32>,
    } else {
    }
    %c0 = arith.constant 0 : index
    %c0_1 = arith.constant 0 : index
    %3 = vector.load %arg7[%c0, %c0_1] : memref<50x128xf32, #tpu.memory_space<vmem>>, vector<50x128xf32>
    %c0_2 = arith.constant 0 : index
    %c0_3 = arith.constant 0 : index
    %4 = vector.load %arg3[%c0_2, %c0_3] : memref<50x64xbf16, #tpu.memory_space<vmem>>, vector<50x64xbf16>
    %c0_4 = arith.constant 0 : index
    %c0_5 = arith.constant 0 : index
    %5 = vector.load %arg4[%c0_4, %c0_5] : memref<64x128xbf16, #tpu.memory_space<vmem>>, vector<64x128xbf16>
    %cst = arith.constant dense<0.000000e+00> : vector<50x128xf32>
    %6 = tpu.matmul %4, %5, %cst {dimension_numbers = #tpu.dot_dimension_numbers<[1], [0], [0], [1], [0, 0, 1, 1], [], []>} : vector<50x64xbf16>, vector<64x128xbf16>, vector<50x128xf32> -> vector<50x128xf32>
    %7 = arith.addf %3, %6 : vector<50x128xf32>
    %c0_6 = arith.constant 0 : index
    %c0_7 = arith.constant 0 : index
    %8 = vector.load %arg7[%c0_6, %c0_7] : memref<50x128xf32, #tpu.memory_space<vmem>>, vector<50x128xf32>
    tpu.vector_store %arg7[%c0_6, %c0_7], %7 {strides = array<i32>} : memref<50x128xf32, #tpu.memory_space<vmem>>, vector<50x128xf32>,
    %c0_i32_8 = arith.constant 0 : i32
    %9 = arith.cmpi eq, %arg2, %c0_i32_8 : i32
    %10 = arith.extui %9 : i1 to i32
    %c0_i32_9 = arith.constant 0 : i32
    %11 = arith.cmpi ne, %10, %c0_i32_9 : i32
    scf.if %11 {
      %c0_10 = arith.constant 0 : index
      %c0_11 = arith.constant 0 : index
      %12 = vector.load %arg7[%c0_10, %c0_11] : memref<50x128xf32, #tpu.memory_space<vmem>>, vector<50x128xf32>
      %c0_12 = arith.constant 0 : index
      %c0_13 = arith.constant 0 : index
      %13 = vector.load %arg5[%c0_12, %c0_13] : memref<1x128xf32, #tpu.memory_space<vmem>>, vector<1x128xf32>
      %14 = vector.broadcast %13 : vector<1x128xf32> to vector<50x128xf32>
      %15 = arith.addf %12, %14 : vector<50x128xf32>
      %16 = arith.truncf %15 : vector<50x128xf32> to vector<50x128xbf16>
      %c0_14 = arith.constant 0 : index
      %c0_15 = arith.constant 0 : index
      %17 = vector.load %arg6[%c0_14, %c0_15] : memref<50x128xbf16, #tpu.memory_space<vmem>>, vector<50x128xbf16>
      tpu.vector_store %arg6[%c0_14, %c0_15], %16 {strides = array<i32>} : memref<50x128xbf16, #tpu.memory_space<vmem>>, vector<50x128xbf16>,
    } else {
    }
    return
  }
  func.func @transform_0(%arg0: i32, %arg1: i32, %arg2: i32) -> (i32, i32) {
    %c0_i32 = arith.constant 0 : i32
    return %arg0, %arg2 : i32, i32
  }
  func.func @transform_1(%arg0: i32, %arg1: i32, %arg2: i32) -> (i32, i32) {
    %c0_i32 = arith.constant 0 : i32
    return %arg2, %arg1 : i32, i32
  }
  func.func @transform_2(%arg0: i32, %arg1: i32, %arg2: i32) -> (i32, i32) {
    %c0_i32 = arith.constant 0 : i32
    %c0_i32_0 = arith.constant 0 : i32
    return %c0_i32, %arg1 : i32, i32
  }
  func.func @transform_3(%arg0: i32, %arg1: i32, %arg2: i32) -> (i32, i32) {
    %c0_i32 = arith.constant 0 : i32
    return %arg0, %arg1 : i32, i32
  }
}

module attributes {stable_mosaic.version = 11 : i64} {
  func.func @_linear_ln_kernel(%arg0: i32, %arg1: i32, %arg2: memref<50x256xbf16, #tpu.memory_space<vmem>>, %arg3: memref<256x64xbf16, #tpu.memory_space<vmem>>, %arg4: memref<1x64xf32, #tpu.memory_space<vmem>>, %arg5: memref<1x64xf32, #tpu.memory_space<vmem>>, %arg6: memref<1x64xf32, #tpu.memory_space<vmem>>, %arg7: memref<50x64xbf16, #tpu.memory_space<vmem>>, %arg8: memref<50x64xf32, #tpu.memory_space<vmem>>) attributes {dimension_semantics = [#tpu.dimension_semantics<parallel>, #tpu.dimension_semantics<arbitrary>], iteration_bounds = array<i64: 1, 1>, scalar_prefetch = 0 : i64, scratch_operands = 1 : i64, tpu.core_type = #tpu.core_type<tc>, window_params = [{transform_indices = @transform_0, window_bounds = array<i64: 50, 256>}, {transform_indices = @transform_1, window_bounds = array<i64: 256, 64>}, {pipeline_mode = #tpu.pipeline_mode<synchronous>, transform_indices = @transform_2, window_bounds = array<i64: 1, 64>}, {pipeline_mode = #tpu.pipeline_mode<synchronous>, transform_indices = @transform_3, window_bounds = array<i64: 1, 64>}, {pipeline_mode = #tpu.pipeline_mode<synchronous>, transform_indices = @transform_4, window_bounds = array<i64: 1, 64>}, {transform_indices = @transform_5, window_bounds = array<i64: 50, 64>}]} {
    %c0_i32 = arith.constant 0 : i32
    %0 = arith.cmpi eq, %arg1, %c0_i32 : i32
    %1 = arith.extui %0 : i1 to i32
    %c0_i32_0 = arith.constant 0 : i32
    %2 = arith.cmpi ne, %1, %c0_i32_0 : i32
    scf.if %2 {
      %cst_10 = arith.constant 0.000000e+00 : f32
      %12 = vector.broadcast %cst_10 : f32 to vector<50x64xf32>
      %c0_11 = arith.constant 0 : index
      %c0_12 = arith.constant 0 : index
      %13 = vector.load %arg8[%c0_11, %c0_12] : memref<50x64xf32, #tpu.memory_space<vmem>>, vector<50x64xf32>
      tpu.vector_store %arg8[%c0_11, %c0_12], %12 {strides = array<i32>} : memref<50x64xf32, #tpu.memory_space<vmem>>, vector<50x64xf32>,
    } else {
    }
    %c0 = arith.constant 0 : index
    %c0_1 = arith.constant 0 : index
    %3 = vector.load %arg8[%c0, %c0_1] : memref<50x64xf32, #tpu.memory_space<vmem>>, vector<50x64xf32>
    %c0_2 = arith.constant 0 : index
    %c0_3 = arith.constant 0 : index
    %4 = vector.load %arg2[%c0_2, %c0_3] : memref<50x256xbf16, #tpu.memory_space<vmem>>, vector<50x256xbf16>
    %c0_4 = arith.constant 0 : index
    %c0_5 = arith.constant 0 : index
    %5 = vector.load %arg3[%c0_4, %c0_5] : memref<256x64xbf16, #tpu.memory_space<vmem>>, vector<256x64xbf16>
    %cst = arith.constant dense<0.000000e+00> : vector<50x64xf32>
    %6 = tpu.matmul %4, %5, %cst {dimension_numbers = #tpu.dot_dimension_numbers<[1], [0], [0], [1], [0, 0, 1, 1], [], []>} : vector<50x256xbf16>, vector<256x64xbf16>, vector<50x64xf32> -> vector<50x64xf32>
    %7 = arith.addf %3, %6 : vector<50x64xf32>
    %c0_6 = arith.constant 0 : index
    %c0_7 = arith.constant 0 : index
    %8 = vector.load %arg8[%c0_6, %c0_7] : memref<50x64xf32, #tpu.memory_space<vmem>>, vector<50x64xf32>
    tpu.vector_store %arg8[%c0_6, %c0_7], %7 {strides = array<i32>} : memref<50x64xf32, #tpu.memory_space<vmem>>, vector<50x64xf32>,
    %c0_i32_8 = arith.constant 0 : i32
    %9 = arith.cmpi eq, %arg1, %c0_i32_8 : i32
    %10 = arith.extui %9 : i1 to i32
    %c0_i32_9 = arith.constant 0 : i32
    %11 = arith.cmpi ne, %10, %c0_i32_9 : i32
    scf.if %11 {
      %c0_10 = arith.constant 0 : index
      %c0_11 = arith.constant 0 : index
      %12 = vector.load %arg8[%c0_10, %c0_11] : memref<50x64xf32, #tpu.memory_space<vmem>>, vector<50x64xf32>
      %c0_12 = arith.constant 0 : index
      %c0_13 = arith.constant 0 : index
      %13 = vector.load %arg4[%c0_12, %c0_13] : memref<1x64xf32, #tpu.memory_space<vmem>>, vector<1x64xf32>
      %14 = vector.broadcast %13 : vector<1x64xf32> to vector<50x64xf32>
      %15 = arith.addf %12, %14 : vector<50x64xf32>
      %cst_14 = arith.constant dense<0.000000e+00> : vector<50xf32>
      %16 = vector.multi_reduction <add>, %15, %cst_14 [1] : vector<50x64xf32> to vector<50xf32>
      %17 = vector.shape_cast %16 : vector<50xf32> to vector<50x1xf32>
      %cst_15 = arith.constant 6.400000e+01 : f32
      %18 = vector.broadcast %cst_15 : f32 to vector<50x1xf32>
      %19 = arith.divf %17, %18 : vector<50x1xf32>
      %20 = vector.broadcast %19 : vector<50x1xf32> to vector<50x64xf32>
      %21 = arith.subf %15, %20 : vector<50x64xf32>
      %22 = arith.mulf %21, %21 : vector<50x64xf32>
      %cst_16 = arith.constant dense<0.000000e+00> : vector<50xf32>
      %23 = vector.multi_reduction <add>, %22, %cst_16 [1] : vector<50x64xf32> to vector<50xf32>
      %24 = vector.shape_cast %23 : vector<50xf32> to vector<50x1xf32>
      %cst_17 = arith.constant 6.400000e+01 : f32
      %25 = vector.broadcast %cst_17 : f32 to vector<50x1xf32>
      %26 = arith.divf %24, %25 : vector<50x1xf32>
      %cst_18 = arith.constant 9.99999974E-6 : f32
      %27 = vector.broadcast %cst_18 : f32 to vector<50x1xf32>
      %28 = arith.addf %26, %27 : vector<50x1xf32>
      %29 = math.rsqrt %28 : vector<50x1xf32>
      %30 = vector.broadcast %29 : vector<50x1xf32> to vector<50x64xf32>
      %31 = arith.mulf %21, %30 : vector<50x64xf32>
      %c0_19 = arith.constant 0 : index
      %c0_20 = arith.constant 0 : index
      %32 = vector.load %arg5[%c0_19, %c0_20] : memref<1x64xf32, #tpu.memory_space<vmem>>, vector<1x64xf32>
      %33 = vector.broadcast %32 : vector<1x64xf32> to vector<50x64xf32>
      %34 = arith.mulf %31, %33 : vector<50x64xf32>
      %c0_21 = arith.constant 0 : index
      %c0_22 = arith.constant 0 : index
      %35 = vector.load %arg6[%c0_21, %c0_22] : memref<1x64xf32, #tpu.memory_space<vmem>>, vector<1x64xf32>
      %36 = vector.broadcast %35 : vector<1x64xf32> to vector<50x64xf32>
      %37 = arith.addf %34, %36 : vector<50x64xf32>
      %38 = arith.truncf %37 : vector<50x64xf32> to vector<50x64xbf16>
      %c0_23 = arith.constant 0 : index
      %c0_24 = arith.constant 0 : index
      %39 = vector.load %arg7[%c0_23, %c0_24] : memref<50x64xbf16, #tpu.memory_space<vmem>>, vector<50x64xbf16>
      tpu.vector_store %arg7[%c0_23, %c0_24], %38 {strides = array<i32>} : memref<50x64xbf16, #tpu.memory_space<vmem>>, vector<50x64xbf16>,
    } else {
    }
    return
  }
  func.func @transform_0(%arg0: i32, %arg1: i32) -> (i32, i32) {
    %c0_i32 = arith.constant 0 : i32
    return %arg0, %arg1 : i32, i32
  }
  func.func @transform_1(%arg0: i32, %arg1: i32) -> (i32, i32) {
    %c0_i32 = arith.constant 0 : i32
    %c0_i32_0 = arith.constant 0 : i32
    return %arg1, %c0_i32 : i32, i32
  }
  func.func @transform_2(%arg0: i32, %arg1: i32) -> (i32, i32) {
    %c0_i32 = arith.constant 0 : i32
    %c0_i32_0 = arith.constant 0 : i32
    %c0_i32_1 = arith.constant 0 : i32
    return %c0_i32, %c0_i32_0 : i32, i32
  }
  func.func @transform_3(%arg0: i32, %arg1: i32) -> (i32, i32) {
    %c0_i32 = arith.constant 0 : i32
    %c0_i32_0 = arith.constant 0 : i32
    %c0_i32_1 = arith.constant 0 : i32
    return %c0_i32, %c0_i32_0 : i32, i32
  }
  func.func @transform_4(%arg0: i32, %arg1: i32) -> (i32, i32) {
    %c0_i32 = arith.constant 0 : i32
    %c0_i32_0 = arith.constant 0 : i32
    %c0_i32_1 = arith.constant 0 : i32
    return %c0_i32, %c0_i32_0 : i32, i32
  }
  func.func @transform_5(%arg0: i32, %arg1: i32) -> (i32, i32) {
    %c0_i32 = arith.constant 0 : i32
    %c0_i32_0 = arith.constant 0 : i32
    return %arg0, %c0_i32 : i32, i32
  }
}

module attributes {stable_mosaic.version = 11 : i64} {
  func.func @_linear_kernel(%arg0: i32, %arg1: i32, %arg2: i32, %arg3: memref<64x64xbf16, #tpu.memory_space<vmem>>, %arg4: memref<64x64xbf16, #tpu.memory_space<vmem>>, %arg5: memref<1x64xf32, #tpu.memory_space<vmem>>, %arg6: memref<64x64xbf16, #tpu.memory_space<vmem>>, %arg7: memref<64x64xf32, #tpu.memory_space<vmem>>) attributes {dimension_semantics = [#tpu.dimension_semantics<parallel>, #tpu.dimension_semantics<parallel>, #tpu.dimension_semantics<arbitrary>], iteration_bounds = array<i64: 2, 1, 1>, scalar_prefetch = 0 : i64, scratch_operands = 1 : i64, tpu.core_type = #tpu.core_type<tc>, window_params = [{transform_indices = @transform_0, window_bounds = array<i64: 64, 64>}, {transform_indices = @transform_1, window_bounds = array<i64: 64, 64>}, {transform_indices = @transform_2, window_bounds = array<i64: 1, 64>}, {transform_indices = @transform_3, window_bounds = array<i64: 64, 64>}]} {
    %c0_i32 = arith.constant 0 : i32
    %0 = arith.cmpi eq, %arg2, %c0_i32 : i32
    %1 = arith.extui %0 : i1 to i32
    %c0_i32_0 = arith.constant 0 : i32
    %2 = arith.cmpi ne, %1, %c0_i32_0 : i32
    scf.if %2 {
      %cst_10 = arith.constant 0.000000e+00 : f32
      %12 = vector.broadcast %cst_10 : f32 to vector<64x64xf32>
      %c0_11 = arith.constant 0 : index
      %c0_12 = arith.constant 0 : index
      %13 = vector.load %arg7[%c0_11, %c0_12] : memref<64x64xf32, #tpu.memory_space<vmem>>, vector<64x64xf32>
      tpu.vector_store %arg7[%c0_11, %c0_12], %12 {strides = array<i32>} : memref<64x64xf32, #tpu.memory_space<vmem>>, vector<64x64xf32>,
    } else {
    }
    %c0 = arith.constant 0 : index
    %c0_1 = arith.constant 0 : index
    %3 = vector.load %arg7[%c0, %c0_1] : memref<64x64xf32, #tpu.memory_space<vmem>>, vector<64x64xf32>
    %c0_2 = arith.constant 0 : index
    %c0_3 = arith.constant 0 : index
    %4 = vector.load %arg3[%c0_2, %c0_3] : memref<64x64xbf16, #tpu.memory_space<vmem>>, vector<64x64xbf16>
    %c0_4 = arith.constant 0 : index
    %c0_5 = arith.constant 0 : index
    %5 = vector.load %arg4[%c0_4, %c0_5] : memref<64x64xbf16, #tpu.memory_space<vmem>>, vector<64x64xbf16>
    %cst = arith.constant dense<0.000000e+00> : vector<64x64xf32>
    %6 = tpu.matmul %4, %5, %cst {dimension_numbers = #tpu.dot_dimension_numbers<[1], [0], [0], [1], [0, 0, 1, 1], [], []>} : vector<64x64xbf16>, vector<64x64xbf16>, vector<64x64xf32> -> vector<64x64xf32>
    %7 = arith.addf %3, %6 : vector<64x64xf32>
    %c0_6 = arith.constant 0 : index
    %c0_7 = arith.constant 0 : index
    %8 = vector.load %arg7[%c0_6, %c0_7] : memref<64x64xf32, #tpu.memory_space<vmem>>, vector<64x64xf32>
    tpu.vector_store %arg7[%c0_6, %c0_7], %7 {strides = array<i32>} : memref<64x64xf32, #tpu.memory_space<vmem>>, vector<64x64xf32>,
    %c0_i32_8 = arith.constant 0 : i32
    %9 = arith.cmpi eq, %arg2, %c0_i32_8 : i32
    %10 = arith.extui %9 : i1 to i32
    %c0_i32_9 = arith.constant 0 : i32
    %11 = arith.cmpi ne, %10, %c0_i32_9 : i32
    scf.if %11 {
      %c0_10 = arith.constant 0 : index
      %c0_11 = arith.constant 0 : index
      %12 = vector.load %arg7[%c0_10, %c0_11] : memref<64x64xf32, #tpu.memory_space<vmem>>, vector<64x64xf32>
      %c0_12 = arith.constant 0 : index
      %c0_13 = arith.constant 0 : index
      %13 = vector.load %arg5[%c0_12, %c0_13] : memref<1x64xf32, #tpu.memory_space<vmem>>, vector<1x64xf32>
      %14 = vector.broadcast %13 : vector<1x64xf32> to vector<64x64xf32>
      %15 = arith.addf %12, %14 : vector<64x64xf32>
      %16 = arith.truncf %15 : vector<64x64xf32> to vector<64x64xbf16>
      %c0_14 = arith.constant 0 : index
      %c0_15 = arith.constant 0 : index
      %17 = vector.load %arg6[%c0_14, %c0_15] : memref<64x64xbf16, #tpu.memory_space<vmem>>, vector<64x64xbf16>
      tpu.vector_store %arg6[%c0_14, %c0_15], %16 {strides = array<i32>} : memref<64x64xbf16, #tpu.memory_space<vmem>>, vector<64x64xbf16>,
    } else {
    }
    return
  }
  func.func @transform_0(%arg0: i32, %arg1: i32, %arg2: i32) -> (i32, i32) {
    %c0_i32 = arith.constant 0 : i32
    return %arg0, %arg2 : i32, i32
  }
  func.func @transform_1(%arg0: i32, %arg1: i32, %arg2: i32) -> (i32, i32) {
    %c0_i32 = arith.constant 0 : i32
    return %arg2, %arg1 : i32, i32
  }
  func.func @transform_2(%arg0: i32, %arg1: i32, %arg2: i32) -> (i32, i32) {
    %c0_i32 = arith.constant 0 : i32
    %c0_i32_0 = arith.constant 0 : i32
    return %c0_i32, %arg1 : i32, i32
  }
  func.func @transform_3(%arg0: i32, %arg1: i32, %arg2: i32) -> (i32, i32) {
    %c0_i32 = arith.constant 0 : i32
    return %arg0, %arg1 : i32, i32
  }
}

module attributes {stable_mosaic.version = 11 : i64} {
  func.func @_attention_kernel(%arg0: i32, %arg1: i32, %arg2: memref<1x64x64xbf16, #tpu.memory_space<vmem>>, %arg3: memref<1x25x128xbf16, #tpu.memory_space<vmem>>, %arg4: memref<64x64xbf16, #tpu.memory_space<vmem>>, %arg5: memref<1x64xf32, #tpu.memory_space<vmem>>, %arg6: memref<1x64x64xf32, #tpu.memory_space<vmem>>, %arg7: memref<64x64xf32, #tpu.memory_space<vmem>>) attributes {dimension_semantics = [#tpu.dimension_semantics<parallel>, #tpu.dimension_semantics<parallel>], iteration_bounds = array<i64: 2, 1>, scalar_prefetch = 0 : i64, scratch_operands = 1 : i64, tpu.core_type = #tpu.core_type<tc>, window_params = [{transform_indices = @transform_0, window_bounds = array<i64: 1, 64, 64>}, {transform_indices = @transform_1, window_bounds = array<i64: 1, 25, 128>}, {pipeline_mode = #tpu.pipeline_mode<synchronous>, transform_indices = @transform_2, window_bounds = array<i64: 64, 64>}, {pipeline_mode = #tpu.pipeline_mode<synchronous>, transform_indices = @transform_3, window_bounds = array<i64: 1, 64>}, {transform_indices = @transform_4, window_bounds = array<i64: 1, 64, 64>}]} {
    %c0 = arith.constant 0 : index
    %c0_0 = arith.constant 0 : index
    %c0_1 = arith.constant 0 : index
    %0 = vector.load %arg2[%c0, %c0_0, %c0_1] : memref<1x64x64xbf16, #tpu.memory_space<vmem>>, vector<1x64x64xbf16>
    %1 = vector.shape_cast %0 : vector<1x64x64xbf16> to vector<64x64xbf16>
    %c0_2 = arith.constant 0 : index
    %c0_3 = arith.constant 0 : index
    %c0_4 = arith.constant 0 : index
    %2 = vector.load %arg3[%c0_2, %c0_3, %c0_4] : memref<1x25x128xbf16, #tpu.memory_space<vmem>>, vector<1x25x128xbf16>
    %3 = vector.shape_cast %2 : vector<1x25x128xbf16> to vector<25x128xbf16>
    %4 = vector.extract_strided_slice %1 {offsets = [0, 0], sizes = [64, 32], strides = [1, 1]} : vector<64x64xbf16> to vector<64x32xbf16>
    %5 = vector.extract_strided_slice %3 {offsets = [0, 0], sizes = [25, 32], strides = [1, 1]} : vector<25x128xbf16> to vector<25x32xbf16>
    %6 = vector.extract_strided_slice %3 {offsets = [0, 64], sizes = [25, 32], strides = [1, 1]} : vector<25x128xbf16> to vector<25x32xbf16>
    %cst = arith.constant dense<0.000000e+00> : vector<64x25xf32>
    %7 = tpu.matmul %4, %5, %cst {dimension_numbers = #tpu.dot_dimension_numbers<[1], [1], [0], [0], [0, 0, 1, 0], [], []>} : vector<64x32xbf16>, vector<25x32xbf16>, vector<64x25xf32> -> vector<64x25xf32>
    %cst_5 = arith.constant dense<0xFF800000> : vector<64xf32>
    %8 = vector.multi_reduction <maximumf>, %7, %cst_5 [1] : vector<64x25xf32> to vector<64xf32>
    %9 = vector.shape_cast %8 : vector<64xf32> to vector<64x1xf32>
    %10 = vector.broadcast %9 : vector<64x1xf32> to vector<64x25xf32>
    %11 = arith.subf %7, %10 : vector<64x25xf32>
    %12 = math.exp %11 : vector<64x25xf32>
    %cst_6 = arith.constant dense<0.000000e+00> : vector<64xf32>
    %13 = vector.multi_reduction <add>, %12, %cst_6 [1] : vector<64x25xf32> to vector<64xf32>
    %14 = vector.shape_cast %13 : vector<64xf32> to vector<64x1xf32>
    %15 = tpu.reciprocal %14 {approx = true} : vector<64x1xf32> -> vector<64x1xf32>
    %16 = vector.broadcast %15 : vector<64x1xf32> to vector<64x25xf32>
    %17 = arith.mulf %12, %16 : vector<64x25xf32>
    %18 = arith.truncf %17 : vector<64x25xf32> to vector<64x25xbf16>
    %cst_7 = arith.constant dense<0.000000e+00> : vector<64x32xf32>
    %19 = tpu.matmul %18, %6, %cst_7 {dimension_numbers = #tpu.dot_dimension_numbers<[1], [0], [0], [1], [0, 0, 1, 1], [], []>} : vector<64x25xbf16>, vector<25x32xbf16>, vector<64x32xf32> -> vector<64x32xf32>
    %c0_8 = arith.constant 0 : index
    %c0_9 = arith.constant 0 : index
    %20 = vector.load %arg7[%c0_8, %c0_9] : memref<64x64xf32, #tpu.memory_space<vmem>>, vector<64x32xf32>
    tpu.vector_store %arg7[%c0_8, %c0_9], %19 {strides = array<i32>} : memref<64x64xf32, #tpu.memory_space<vmem>>, vector<64x32xf32>,
    %21 = vector.extract_strided_slice %1 {offsets = [0, 32], sizes = [64, 32], strides = [1, 1]} : vector<64x64xbf16> to vector<64x32xbf16>
    %22 = vector.extract_strided_slice %3 {offsets = [0, 32], sizes = [25, 32], strides = [1, 1]} : vector<25x128xbf16> to vector<25x32xbf16>
    %23 = vector.extract_strided_slice %3 {offsets = [0, 96], sizes = [25, 32], strides = [1, 1]} : vector<25x128xbf16> to vector<25x32xbf16>
    %cst_10 = arith.constant dense<0.000000e+00> : vector<64x25xf32>
    %24 = tpu.matmul %21, %22, %cst_10 {dimension_numbers = #tpu.dot_dimension_numbers<[1], [1], [0], [0], [0, 0, 1, 0], [], []>} : vector<64x32xbf16>, vector<25x32xbf16>, vector<64x25xf32> -> vector<64x25xf32>
    %cst_11 = arith.constant dense<0xFF800000> : vector<64xf32>
    %25 = vector.multi_reduction <maximumf>, %24, %cst_11 [1] : vector<64x25xf32> to vector<64xf32>
    %26 = vector.shape_cast %25 : vector<64xf32> to vector<64x1xf32>
    %27 = vector.broadcast %26 : vector<64x1xf32> to vector<64x25xf32>
    %28 = arith.subf %24, %27 : vector<64x25xf32>
    %29 = math.exp %28 : vector<64x25xf32>
    %cst_12 = arith.constant dense<0.000000e+00> : vector<64xf32>
    %30 = vector.multi_reduction <add>, %29, %cst_12 [1] : vector<64x25xf32> to vector<64xf32>
    %31 = vector.shape_cast %30 : vector<64xf32> to vector<64x1xf32>
    %32 = tpu.reciprocal %31 {approx = true} : vector<64x1xf32> -> vector<64x1xf32>
    %33 = vector.broadcast %32 : vector<64x1xf32> to vector<64x25xf32>
    %34 = arith.mulf %29, %33 : vector<64x25xf32>
    %35 = arith.truncf %34 : vector<64x25xf32> to vector<64x25xbf16>
    %cst_13 = arith.constant dense<0.000000e+00> : vector<64x32xf32>
    %36 = tpu.matmul %35, %23, %cst_13 {dimension_numbers = #tpu.dot_dimension_numbers<[1], [0], [0], [1], [0, 0, 1, 1], [], []>} : vector<64x25xbf16>, vector<25x32xbf16>, vector<64x32xf32> -> vector<64x32xf32>
    %c0_14 = arith.constant 0 : index
    %c32 = arith.constant 32 : index
    %37 = vector.load %arg7[%c0_14, %c32] : memref<64x64xf32, #tpu.memory_space<vmem>>, vector<64x32xf32>
    tpu.vector_store %arg7[%c0_14, %c32], %36 {strides = array<i32>} : memref<64x64xf32, #tpu.memory_space<vmem>>, vector<64x32xf32>,
    %c0_15 = arith.constant 0 : index
    %c0_16 = arith.constant 0 : index
    %38 = vector.load %arg7[%c0_15, %c0_16] : memref<64x64xf32, #tpu.memory_space<vmem>>, vector<64x64xf32>
    %39 = arith.truncf %38 : vector<64x64xf32> to vector<64x64xbf16>
    %c0_17 = arith.constant 0 : index
    %c0_18 = arith.constant 0 : index
    %40 = vector.load %arg4[%c0_17, %c0_18] : memref<64x64xbf16, #tpu.memory_space<vmem>>, vector<64x64xbf16>
    %cst_19 = arith.constant dense<0.000000e+00> : vector<64x64xf32>
    %41 = tpu.matmul %39, %40, %cst_19 {dimension_numbers = #tpu.dot_dimension_numbers<[1], [0], [0], [1], [0, 0, 1, 1], [], []>} : vector<64x64xbf16>, vector<64x64xbf16>, vector<64x64xf32> -> vector<64x64xf32>
    %c0_20 = arith.constant 0 : index
    %c0_21 = arith.constant 0 : index
    %42 = vector.load %arg5[%c0_20, %c0_21] : memref<1x64xf32, #tpu.memory_space<vmem>>, vector<1x64xf32>
    %43 = vector.broadcast %42 : vector<1x64xf32> to vector<64x64xf32>
    %44 = arith.addf %41, %43 : vector<64x64xf32>
    %45 = vector.shape_cast %44 : vector<64x64xf32> to vector<1x64x64xf32>
    %c0_22 = arith.constant 0 : index
    %c0_23 = arith.constant 0 : index
    %c0_24 = arith.constant 0 : index
    %46 = vector.load %arg6[%c0_22, %c0_23, %c0_24] : memref<1x64x64xf32, #tpu.memory_space<vmem>>, vector<1x64x64xf32>
    tpu.vector_store %arg6[%c0_22, %c0_23, %c0_24], %45 {strides = array<i32>} : memref<1x64x64xf32, #tpu.memory_space<vmem>>, vector<1x64x64xf32>,
    return
  }
  func.func @transform_0(%arg0: i32, %arg1: i32) -> (i32, i32, i32) {
    %c0_i32 = arith.constant 0 : i32
    %c0_i32_0 = arith.constant 0 : i32
    return %arg0, %arg1, %c0_i32 : i32, i32, i32
  }
  func.func @transform_1(%arg0: i32, %arg1: i32) -> (i32, i32, i32) {
    %c0_i32 = arith.constant 0 : i32
    %c0_i32_0 = arith.constant 0 : i32
    %c0_i32_1 = arith.constant 0 : i32
    return %arg0, %c0_i32, %c0_i32_0 : i32, i32, i32
  }
  func.func @transform_2(%arg0: i32, %arg1: i32) -> (i32, i32) {
    %c0_i32 = arith.constant 0 : i32
    %c0_i32_0 = arith.constant 0 : i32
    %c0_i32_1 = arith.constant 0 : i32
    return %c0_i32, %c0_i32_0 : i32, i32
  }
  func.func @transform_3(%arg0: i32, %arg1: i32) -> (i32, i32) {
    %c0_i32 = arith.constant 0 : i32
    %c0_i32_0 = arith.constant 0 : i32
    %c0_i32_1 = arith.constant 0 : i32
    return %c0_i32, %c0_i32_0 : i32, i32
  }
  func.func @transform_4(%arg0: i32, %arg1: i32) -> (i32, i32, i32) {
    %c0_i32 = arith.constant 0 : i32
    %c0_i32_0 = arith.constant 0 : i32
    return %arg0, %arg1, %c0_i32 : i32, i32, i32
  }
}

</mosaic_0001>

<bundles_post_ra>
// kernel: pvt_attention_forward.4
= control target key start
LH: loop header
LB: loop body
LE: loop exit
PB: predicated region body
PF: predicated region fallthrough
CT: control target
= control target key end

     0   :  { %s690_s12 = smov 0   ;;  %s692_s13 = smov 0   ;;  %s783_s0 = inlined_call_operand.vmem [shape: bf16[128,64], index: 0, kind: input, shape index: {}]   ;;  %s784_s1 = inlined_call_operand.vmem [shape: bf16[64,64], index: 1, kind: input, shape index: {}]   ;;  %s785_s2 = inlined_call_operand.vmem [shape: f32[1,64], index: 2, kind: input, shape index: {}]   ;;  %s786_s3 = inlined_call_operand.vmem [shape: bf16[128,64], index: 3, kind: output, shape index: {}]  }
   0x1   :  { %s694_s14 = smov 0  }
   0x2 LB: > { %s32_s15 = sadd.s32 1, %s663_s13  ;;  %p556_p0 = scmp.ge.s32.totalorder %s667_s14, 1  ;;  %s667_s14 = sphi %s694_s14, %s13_s14   ;;  %s663_s13 = sphi %s692_s13, %s788_s13   ;;  %s659_s12 = sphi %s690_s12, %s787_s12  }
   0x3   : > { %p34_p1 = scmp.ge.s32.totalorder %s32_s15, 2  ;;  %p188_p2 = scmp.lt.s32.totalorder %s667_s14, 3 }
   0x5   : > { %s790_s15 = smov (%p34_p1, %s32_s15), 0  ;;  %p189_p3 = pnand %p556_p0, %p188_p2 }
   0x6   : > { %s557_s18 = sshll.u32 (!%p189_p3), %s659_s12, 3 }
   0x7   : > { %192 = sbr.rel (%p189_p3) target bundleno = 185 (0xb9), region = 32  ;;  %p230_p4 = scmp.lt.s32.totalorder (!%p189_p3), %s557_s18, 15 }
   0xc   : > { %v606_v0 = vld [vmem:[%s784_s1 + $0x18] sm:$0xff]  ;;  %vm264_vm0 = vcmask 523264   ;;  %v669_v1 = vmov 0.0   ;;  %v605_v2 = vld [vmem:[%s784_s1 + $0x10] sm:$0xff]  ;;  %s792_s18 = smov (!%p230_p4, %s557_s18), 15  ;;  %v604_v3 = vld [vmem:[%s784_s1 + $0x8] sm:$0xff] }
   0xd   : > { %265 = vst.msk [vmem:[#allocation2] sm:$0xff] %vm264_vm0, %v669_v1  ;;  %358 = vmatpush.bf16.msra.mxu0 %v606_v0  ;;  %607 = vmatpush.bf16.msra.mxu1 %v606_v0  ;;  %s558_s23 = sshll.u32 %s792_s18, 2  ;;  %v603_v4 = vld [vmem:[%s784_s1] sm:$0xff]  ;;  %vm430_vm1 = vcmask 519168  }
   0xe   : > { %266 = vst.msk [vmem:[#allocation2 + $0x8] sm:$0xff] %vm264_vm0, %v669_v1  ;;  %608 = vmatpush.bf16.msra.mxu2 %v606_v0  ;;  %609 = vmatpush.bf16.msra.mxu3 %v606_v0  ;;  %s236_s28 = scalar_lea.vmem %s783_s0, %s558_s23  ;;  %v644_v19 = vld [vmem:[%s785_s2] ss:$0 sm:$0xff]  ;;  %s752_s6 = scalar_lea.vmem %s786_s3, %s558_s23 }
   0xf   : > { %267 = vst.msk [vmem:[#allocation2 + $0x10] sm:$0xff] %vm264_vm0, %v669_v1  ;;  %v599_v5 = vld [vmem:[%s236_s28] sm:$0xff]  ;;  %v600_v6 = vld [vmem:[%s236_s28 + $0x8] sm:$0xff]  ;;  %v601_v7 = vld [vmem:[%s236_s28 + $0x10] sm:$0xff] }
  0x10   : > { %268 = vst.msk [vmem:[#allocation2 + $0x18] sm:$0xff] %vm264_vm0, %v669_v1  ;;  %v602_v8 = vld [vmem:[%s236_s28 + $0x18] sm:$0xff] }
  0x11   : > { %269 = vst.msk [vmem:[#allocation2 + $0x20] sm:$0xff] %vm264_vm0, %v669_v1  ;;  %359 = vmatpush.bf16.msra.mxu0 %v605_v2  ;;  %610 = vmatpush.bf16.msra.mxu1 %v605_v2 }
  0x12   : > { %270 = vst.msk [vmem:[#allocation2 + $0x28] sm:$0xff] %vm264_vm0, %v669_v1  ;;  %611 = vmatpush.bf16.msra.mxu2 %v605_v2  ;;  %612 = vmatpush.bf16.msra.mxu3 %v605_v2 }
  0x13   : > { %271 = vst.msk [vmem:[#allocation2 + $0x30] sm:$0xff] %vm264_vm0, %v669_v1 }
  0x14   : > { %272 = vst.msk [vmem:[#allocation2 + $0x38] sm:$0xff] %vm264_vm0, %v669_v1  ;;  %v273_v9 = vld [vmem:[#allocation2] sm:$0xff] }
  0x15   : > { %360 = vmatpush.bf16.msra.mxu0 %v604_v3  ;;  %613 = vmatpush.bf16.msra.mxu1 %v604_v3  ;;  %v274_v17 = vld [vmem:[#allocation2 + $0x8] sm:$0xff] }
  0x16   : > { %614 = vmatpush.bf16.msra.mxu2 %v604_v3  ;;  %615 = vmatpush.bf16.msra.mxu3 %v604_v3  ;;  %v275_v10 = vld [vmem:[#allocation2 + $0x10] sm:$0xff] }
  0x17   : > { %v276_v18 = vld [vmem:[#allocation2 + $0x18] sm:$0xff] }
  0x18   : > { %v277_v15 = vld [vmem:[#allocation2 + $0x20] sm:$0xff] }
  0x19   : > { %361 = vmatpush.bf16.msra.mxu0 %v603_v4  ;;  %616 = vmatpush.bf16.msra.mxu1 %v603_v4  ;;  %v278_v33 = vld [vmem:[#allocation2 + $0x28] sm:$0xff] }
  0x1a   : > { %617 = vmatpush.bf16.msra.mxu2 %v603_v4  ;;  %618 = vmatpush.bf16.msra.mxu3 %v603_v4  ;;  %v279_v16 = vld [vmem:[#allocation2 + $0x30] sm:$0xff] }
  0x1b   : > { %v280_v34 = vld [vmem:[#allocation2 + $0x38] sm:$0xff] }
  0x1c   : > { %593 = vmatmul.msk.bf16.vlgmr.msra.gmra.mxu0 %vm264_vm0, %v599_v5  ;;  %594 = vmatmul.msk.bf16.vlgmr.msra.gmra.mxu1 %vm264_vm0, %v600_v6 }
  0x1d   : > { %595 = vmatmul.msk.bf16.vlgmr.msra.gmra.mxu2 %vm264_vm0, %v601_v7  ;;  %596 = vmatmul.msk.bf16.vlgmr.msra.gmra.mxu3 %vm264_vm0, %v602_v8 }
  0x99   : > { %v363_v11 = vpop.f32.mrf.mxu0  ;;  %v368_v12 = vpop.f32.mrf.mxu1 }
  0x9a   : > { %v383_v13 = vadd.f32 %v363_v11, %v273_v9  ;;  %v385_v14 = vadd.f32 %v368_v12, %v275_v10 }
  0x9c   : > { %391 = vst.msk [vmem:[#allocation2] sm:$0xff] %vm264_vm0, %v383_v13 }
  0x9d   : > { %393 = vst.msk [vmem:[#allocation2 + $0x10] sm:$0xff] %vm264_vm0, %v385_v14 }
  0xa0   : > { %v373_v20 = vpop.f32.mrf.mxu2  ;;  %v378_v21 = vpop.f32.mrf.mxu3 }
  0xa1   : > { %v387_v22 = vadd.f32 %v373_v20, %v277_v15  ;;  %v389_v23 = vadd.f32 %v378_v21, %v279_v16  ;;  %v365_v24 = vpop.f32.mrf.mxu0  ;;  %v370_v25 = vpop.f32.mrf.mxu1 }
  0xa2   : > { %v384_v26 = vadd.f32 %v365_v24, %v274_v17  ;;  %v386_v27 = vadd.f32 %v370_v25, %v276_v18 }
  0xa3   : > { %v402_v28 = vld [vmem:[#allocation2] sm:$0xff]  ;;  %395 = vst.msk [vmem:[#allocation2 + $0x20] sm:$0xff] %vm264_vm0, %v387_v22 }
  0xa4   : > { %v414_v29 = vadd.f32 %v644_v19, %v402_v28  ;;  %v404_v30 = vld [vmem:[#allocation2 + $0x10] sm:$0xff]  ;;  %397 = vst.msk [vmem:[#allocation2 + $0x30] sm:$0xff] %vm264_vm0, %v389_v23 }
  0xa5   : > { %v416_v31 = vadd.f32 %v644_v19, %v404_v30  ;;  %392 = vst.msk [vmem:[#allocation2 + $0x8] sm:$0xff] %vm264_vm0, %v384_v26 }
  0xa6   : > { %v422_v32 = vpack.c.bf16 %v414_v29, %v414_v29  ;;  %394 = vst.msk [vmem:[#allocation2 + $0x18] sm:$0xff] %vm264_vm0, %v386_v27 }
  0xa7   : > { %v424_v35 = vpack.c.bf16 %v416_v31, %v416_v31 }
  0xa8   : > { %431 = vst.msk [vmem:[%s752_s6] sm:$0xf] %vm430_vm1, %v422_v32  ;;  %v375_v36 = vpop.f32.mrf.mxu2  ;;  %v380_v37 = vpop.f32.mrf.mxu3 }
  0xa9   : > { %433 = vst.msk [vmem:[%s752_s6 + $0x8] sm:$0xf] %vm430_vm1, %v424_v35  ;;  %v388_v38 = vadd.f32 %v375_v36, %v278_v33  ;;  %v390_v39 = vadd.f32 %v380_v37, %v280_v34 }
  0xaa   : > { %v406_v40 = vld [vmem:[#allocation2 + $0x20] sm:$0xff] }
  0xab   : > { %v418_v41 = vadd.f32 %v644_v19, %v406_v40  ;;  %v408_v42 = vld [vmem:[#allocation2 + $0x30] sm:$0xff]  ;;  %396 = vst.msk [vmem:[#allocation2 + $0x28] sm:$0xff] %vm264_vm0, %v388_v38 }
  0xac   : > { %v420_v43 = vadd.f32 %v644_v19, %v408_v42  ;;  %v403_v44 = vld [vmem:[#allocation2 + $0x8] sm:$0xff]  ;;  %398 = vst.msk [vmem:[#allocation2 + $0x38] sm:$0xff] %vm264_vm0, %v390_v39 }
  0xad   : > { %v426_v45 = vpack.c.bf16 %v418_v41, %v418_v41  ;;  %v415_v46 = vadd.f32 %v644_v19, %v403_v44  ;;  %v405_v47 = vld [vmem:[#allocation2 + $0x18] sm:$0xff] }
  0xae   : > { %v428_v48 = vpack.c.bf16 %v420_v43, %v420_v43  ;;  %v417_v49 = vadd.f32 %v644_v19, %v405_v47 }
  0xaf   : > { %435 = vst.msk [vmem:[%s752_s6 + $0x10] sm:$0xf] %vm430_vm1, %v426_v45  ;;  %v423_v50 = vpack.c.bf16 %v415_v46, %v415_v46 }
  0xb0   : > { %437 = vst.msk [vmem:[%s752_s6 + $0x18] sm:$0xf] %vm430_vm1, %v428_v48  ;;  %v425_v51 = vpack.c.bf16 %v417_v49, %v417_v49 }
  0xb1   : > { %432 = vst.msk [vmem:[%s752_s6 + $0x4] sm:$0xf] %vm430_vm1, %v423_v50 }
  0xb2   : > { %434 = vst.msk [vmem:[%s752_s6 + $0xc] sm:$0xf] %vm430_vm1, %v425_v51  ;;  %v407_v52 = vld [vmem:[#allocation2 + $0x28] sm:$0xff] }
  0xb3   : > { %v419_v53 = vadd.f32 %v644_v19, %v407_v52  ;;  %v409_v54 = vld [vmem:[#allocation2 + $0x38] sm:$0xff] }
  0xb4   : > { %v421_v55 = vadd.f32 %v644_v19, %v409_v54 }
  0xb5   : > { %v427_v56 = vpack.c.bf16 %v419_v53, %v419_v53 }
  0xb6   : > { %v429_v57 = vpack.c.bf16 %v421_v55, %v421_v55 }
  0xb7   : > { %436 = vst.msk [vmem:[%s752_s6 + $0x14] sm:$0xf] %vm430_vm1, %v427_v56 }
  0xb8   : > { %438 = vst.msk [vmem:[%s752_s6 + $0x1c] sm:$0xf] %vm430_vm1, %v429_v57 }
  0xb9 PF: > { %s13_s14 = sadd.s32 1, %s667_s14   ;;  %s787_s12 = smov %s663_s13 }
  0xba   : > { %p10_p5 = scmp.ge.s32.totalorder %s13_s14, 4   ;;  %s788_s13 = smov %s790_s15 }
  0xbc   :  { %12 = sbr.rel (!%p10_p5) target bundleno = 2 (0x2), region = 76 }

// kernel: pvt_attention_forward.6
= control target key start
LH: loop header
LB: loop body
LE: loop exit
PB: predicated region body
PF: predicated region fallthrough
CT: control target
= control target key end

     0   :  { %v254_v1 = vmov 0.0   ;;  %vm90_vm0 = vcmask 523264   ;;  %s314_s1 = inlined_call_operand.vmem [shape: bf16[64,128], index: 1, kind: input, shape index: {}]   ;;  %s315_s2 = inlined_call_operand.vmem [shape: f32[1,128], index: 2, kind: input, shape index: {}]   ;;  %s316_s0 = inlined_call_operand.vmem [shape: bf16[50,64], index: 0, kind: input, shape index: {}]   ;;  %s317_s3 = inlined_call_operand.vmem [shape: bf16[50,128], index: 3, kind: output, shape index: {}]  }
   0x1   :  { %v222_v0 = vld [vmem:[%s314_s1 + $0x18] sm:$0xff]  ;;  %25 = vst [vmem:[#allocation2 + $0x28] sm:$0x3] %v254_v1  ;;  %v221_v2 = vld [vmem:[%s314_s1 + $0x10] sm:$0xff]  ;;  %v220_v3 = vld [vmem:[%s314_s1 + $0x8] sm:$0xff] }
   0x2   :  { %107 = vmatpush.bf16.msra.mxu0 %v222_v0  ;;  %240 = vmatpush.bf16.msra.mxu1 %v222_v0  ;;  %v39_v4 = vld [vmem:[%s316_s0 + $0x18] sm:$0x1]  ;;  %v219_v5 = vld [vmem:[%s314_s1] sm:$0xff]  ;;  %v217_v8 = vld [vmem:[%s316_s0 + $0x8] sm:$0xff] }
   0x3   :  { %241 = vmatpush.bf16.msra.mxu2 %v222_v0  ;;  %242 = vmatpush.bf16.msra.mxu3 %v222_v0  ;;  %v61_v6 = vunpack.c.l.b16 %v39_v4  ;;  %v216_v7 = vld [vmem:[%s316_s0] sm:$0xff]  ;;  %v218_v9 = vld [vmem:[%s316_s0 + $0x10] sm:$0xff] }
   0x4   :  { %v253_v14 = vld [vmem:[%s315_s2] ss:$0 sm:$0xff] }
   0x5   :  { %v65_v10 = vpack.c.b16 %v61_v6, %v61_v6 }
   0x6   :  { %108 = vmatpush.bf16.msra.mxu0 %v221_v2  ;;  %243 = vmatpush.bf16.msra.mxu1 %v221_v2 }
   0x7   :  { %244 = vmatpush.bf16.msra.mxu2 %v221_v2  ;;  %245 = vmatpush.bf16.msra.mxu3 %v221_v2 }
   0x8   :  { %v32_v13 = vld [vmem:[#allocation2 + $0x28] sm:$0x3] }
   0xa   :  { %109 = vmatpush.bf16.msra.mxu0 %v220_v3  ;;  %246 = vmatpush.bf16.msra.mxu1 %v220_v3 }
   0xb   :  { %247 = vmatpush.bf16.msra.mxu2 %v220_v3  ;;  %248 = vmatpush.bf16.msra.mxu3 %v220_v3 }
   0xe   :  { %110 = vmatpush.bf16.msra.mxu0 %v219_v5  ;;  %249 = vmatpush.bf16.msra.mxu1 %v219_v5 }
   0xf   :  { %250 = vmatpush.bf16.msra.mxu2 %v219_v5  ;;  %251 = vmatpush.bf16.msra.mxu3 %v219_v5 }
  0x11   :  { %212 = vmatmul.msk.bf16.vlgmr.msra.gmra.mxu0 %vm90_vm0, %v216_v7  ;;  %213 = vmatmul.msk.bf16.vlgmr.msra.gmra.mxu1 %vm90_vm0, %v217_v8 }
  0x12   :  { %214 = vmatmul.msk.bf16.vlgmr.msra.gmra.mxu2 %vm90_vm0, %v218_v9  ;;  %215 = vmatmul.msk.bf16.vlgmr.msra.gmra.mxu3 %vm90_vm0, %v65_v10 }
  0x8e   :  { %v112_v11 = vpop.f32.mrf.mxu0  ;;  %v117_v12 = vpop.f32.mrf.mxu1 }
  0x8f   :  { %v159_v20 = vadd.f32 %v253_v14, %v112_v11  ;;  %v161_v21 = vadd.f32 %v253_v14, %v117_v12 }
  0x95   :  { %v122_v15 = vpop.f32.mrf.mxu2  ;;  %v127_v16 = vpop.f32.mrf.mxu3 }
  0x96   :  { %v137_v17 = vadd.f32 %v127_v16, %v32_v13  ;;  %v114_v18 = vpop.f32.mrf.mxu0  ;;  %v119_v19 = vpop.f32.mrf.mxu1  ;;  %v163_v28 = vadd.f32 %v253_v14, %v122_v15 }
  0x97   :  { %v160_v22 = vadd.f32 %v253_v14, %v114_v18  ;;  %v162_v23 = vadd.f32 %v253_v14, %v119_v19 }
  0x98   :  { %144 = vst [vmem:[#allocation2 + $0x28] sm:$0x3] %v137_v17 }
  0x99   :  { %v226_v24 = vpack.c.bf16 %v160_v22, %v159_v20  ;;  %v231_v25 = vpack.c.bf16 %v162_v23, %v161_v21 }
  0x9b   :  { %227 = vst [vmem:[%s317_s3] sm:$0xff] %v226_v24  }
  0x9c   :  { %238 = vst [vmem:[%s317_s3 + $0x8] sm:$0xff] %v231_v25  }
  0x9d   :  { %v124_v26 = vpop.f32.mrf.mxu2  ;;  %v129_v27 = vpop.f32.mrf.mxu3 }
  0x9e   :  { %v164_v30 = vadd.f32 %v253_v14, %v124_v26 }
  0x9f   :  { %v154_v29 = vld [vmem:[#allocation2 + $0x28] sm:$0x3] }
  0xa0   :  { %v165_v31 = vadd.f32 %v253_v14, %v154_v29  ;;  %v236_v32 = vpack.c.bf16 %v164_v30, %v163_v28 }
  0xa2   :  { %v172_v33 = vpack.c.bf16 %v165_v31, %v165_v31  ;;  %239 = vst [vmem:[%s317_s3 + $0x10] sm:$0xff] %v236_v32  }
  0xa4   :  { %179 = vst [vmem:[%s317_s3 + $0x18] sm:$0x1] %v172_v33 }

// kernel: pvt_attention_forward.5
= control target key start
LH: loop header
LB: loop body
LE: loop exit
PB: predicated region body
PF: predicated region fallthrough
CT: control target
= control target key end

     0   :  { %vm24_vm0 = vcmask 523264   ;;  %v655_v39 = vmov 0.0   ;;  %vm31_vm1 = vcmask 517120   ;;  %vm495_vm7 = vcmask 519168   ;;  %s921_s1 = inlined_call_operand.vmem [shape: bf16[256,64], index: 1, kind: input, shape index: {}]   ;;  %s922_s0 = inlined_call_operand.vmem [shape: bf16[50,256], index: 0, kind: input, shape index: {}]   ;;  %s923_s2 = inlined_call_operand.vmem [shape: f32[1,64], index: 2, kind: input, shape index: {}]   ;;  %s924_s3 = inlined_call_operand.vmem [shape: f32[1,64], index: 3, kind: input, shape index: {}]   ;;  %s925_s4 = inlined_call_operand.vmem [shape: f32[1,64], index: 4, kind: input, shape index: {}]   ;;  %s926_s5 = inlined_call_operand.vmem [shape: bf16[50,64], index: 5, kind: output, shape index: {}]  }
   0x1   :  { %v609_v0 = vld [vmem:[%s921_s1 + $0x38] sm:$0xff]  ;;  %v608_v2 = vld [vmem:[%s921_s1 + $0x30] sm:$0xff]  ;;  %v607_v4 = vld [vmem:[%s921_s1 + $0x28] sm:$0xff]  ;;  %25 = vst.msk [vmem:[#allocation2] sm:$0xff] %vm24_vm0, %v655_v39 }
   0x2   :  { %v617_v1 = vld [vmem:[%s921_s1 + $0x78] sm:$0xff]  ;;  %212 = vmatpush.bf16.msra.mxu0 %v609_v0  ;;  %618 = vmatpush.bf16.msra.mxu2 %v609_v0  ;;  %v616_v3 = vld [vmem:[%s921_s1 + $0x70] sm:$0xff]  ;;  %v615_v5 = vld [vmem:[%s921_s1 + $0x68] sm:$0xff]  ;;  %26 = vst.msk [vmem:[#allocation2 + $0x8] sm:$0xff] %vm24_vm0, %v655_v39 }
   0x3   :  { %240 = vmatpush.bf16.msra.mxu1 %v617_v1  ;;  %626 = vmatpush.bf16.msra.mxu3 %v617_v1  ;;  %v606_v6 = vld [vmem:[%s921_s1 + $0x20] sm:$0xff]  ;;  %v605_v8 = vld [vmem:[%s921_s1 + $0x18] sm:$0xff]  ;;  %v604_v10 = vld [vmem:[%s921_s1 + $0x10] sm:$0xff]  ;;  %27 = vst.msk [vmem:[#allocation2 + $0x10] sm:$0xff] %vm24_vm0, %v655_v39 }
   0x4   :  { %v614_v7 = vld [vmem:[%s921_s1 + $0x60] sm:$0xff]  ;;  %v613_v9 = vld [vmem:[%s921_s1 + $0x58] sm:$0xff]  ;;  %v612_v11 = vld [vmem:[%s921_s1 + $0x50] sm:$0xff]  ;;  %28 = vst.msk [vmem:[#allocation2 + $0x18] sm:$0xff] %vm24_vm0, %v655_v39 }
   0x5   :  { %v603_v12 = vld [vmem:[%s921_s1 + $0x8] sm:$0xff]  ;;  %v602_v14 = vld [vmem:[%s921_s1] sm:$0xff]  ;;  %v46_v28 = vld [vmem:[%s922_s0 + $0x30] sm:$0x11]  ;;  %29 = vst.msk [vmem:[#allocation2 + $0x20] sm:$0xff] %vm24_vm0, %v655_v39 }
   0x6   :  { %213 = vmatpush.bf16.msra.mxu0 %v608_v2  ;;  %619 = vmatpush.bf16.msra.mxu2 %v608_v2  ;;  %v611_v13 = vld [vmem:[%s921_s1 + $0x48] sm:$0xff]  ;;  %v610_v15 = vld [vmem:[%s921_s1 + $0x40] sm:$0xff]  ;;  %v98_v29 = vunpack.c.l.b16 %v46_v28  ;;  %v518_v30 = vld [vmem:[%s922_s0 + $0x10] sm:$0xf]  ;;  %v99_v32 = vunpack.c.h.b16 %v46_v28  ;;  %30 = vst.msk [vmem:[#allocation2 + $0x28] sm:$0xff] %vm24_vm0, %v655_v39 }
   0x7   :  { %241 = vmatpush.bf16.msra.mxu1 %v616_v3  ;;  %627 = vmatpush.bf16.msra.mxu3 %v616_v3  ;;  %v510_v16 = vld [vmem:[%s922_s0] sm:$0xf]  ;;  %v597_v17 = vld [vmem:[%s922_s0 + $0x4] sm:$0xf0]  ;;  %v596_v20 = vld [vmem:[%s922_s0 + $0x4] sm:$0xf] }
   0x8   :  { %v526_v18 = vld [vmem:[%s922_s0 + $0x20] sm:$0xf]  ;;  %v601_v19 = vld [vmem:[%s922_s0 + $0x24] sm:$0xf0]  ;;  %v512_v21 = vld [vmem:[%s922_s0 + $0x8] sm:$0xf0]  ;;  %v511_v24 = vor.u32 %v597_v17, %v510_v16  ;;  %v106_v36 = vpack.c.b16 %v98_v29, %v98_v29  ;;  %v107_v38 = vpack.c.b16 %v99_v32, %v99_v32 }
   0x9   :  { %v600_v22 = vld [vmem:[%s922_s0 + $0x24] sm:$0xf]  ;;  %v528_v23 = vld [vmem:[%s922_s0 + $0x28] sm:$0xf0]  ;;  %v527_v25 = vor.u32 %v601_v19, %v526_v18  ;;  %v515_v26 = vor.u32 %v596_v20, %v512_v21  ;;  %v599_v31 = vld [vmem:[%s922_s0 + $0x14] sm:$0xf0] }
   0xa   :  { %214 = vmatpush.bf16.msra.mxu0 %v607_v4  ;;  %620 = vmatpush.bf16.msra.mxu2 %v607_v4  ;;  %v531_v27 = vor.u32 %v600_v22, %v528_v23  ;;  %v598_v33 = vld [vmem:[%s922_s0 + $0x14] sm:$0xf]  ;;  %v520_v34 = vld [vmem:[%s922_s0 + $0x18] sm:$0xf0]  ;;  %v519_v35 = vor.u32 %v599_v31, %v518_v30  ;;  %32 = vst.msk [vmem:[#allocation2 + $0x30] sm:$0x3] %vm31_vm1, %v655_v39 }
   0xb   :  { %242 = vmatpush.bf16.msra.mxu1 %v615_v5  ;;  %628 = vmatpush.bf16.msra.mxu3 %v615_v5  ;;  %v523_v37 = vor.u32 %v598_v33, %v520_v34  ;;  %v33_v41 = vld [vmem:[#allocation2] sm:$0xff]  ;;  %v34_v50 = vld [vmem:[#allocation2 + $0x8] sm:$0xff]  ;;  %v35_v0 = vld [vmem:[#allocation2 + $0x10] sm:$0xff] }
   0xc   :  { %v37_v46 = vld [vmem:[#allocation2 + $0x20] sm:$0xff]  ;;  %v36_v16 = vld [vmem:[#allocation2 + $0x18] sm:$0xff] }
   0xd   :  { %v636_v54 = vld [vmem:[%s923_s2] ss:$0 sm:$0xff]  ;;  %v38_v59 = vld [vmem:[#allocation2 + $0x28] sm:$0xff] }
   0xe   :  { %215 = vmatpush.bf16.msra.mxu0 %v606_v6  ;;  %621 = vmatpush.bf16.msra.mxu2 %v606_v6 }
   0xf   :  { %243 = vmatpush.bf16.msra.mxu1 %v614_v7  ;;  %629 = vmatpush.bf16.msra.mxu3 %v614_v7 }
  0x12   :  { %216 = vmatpush.bf16.msra.mxu0 %v605_v8  ;;  %622 = vmatpush.bf16.msra.mxu2 %v605_v8 }
  0x13   :  { %244 = vmatpush.bf16.msra.mxu1 %v613_v9  ;;  %630 = vmatpush.bf16.msra.mxu3 %v613_v9 }
  0x16   :  { %217 = vmatpush.bf16.msra.mxu0 %v604_v10  ;;  %623 = vmatpush.bf16.msra.mxu2 %v604_v10 }
  0x17   :  { %245 = vmatpush.bf16.msra.mxu1 %v612_v11  ;;  %631 = vmatpush.bf16.msra.mxu3 %v612_v11  ;;  %v39_v11 = vld [vmem:[#allocation2 + $0x30] sm:$0x3] }
  0x1a   :  { %218 = vmatpush.bf16.msra.mxu0 %v603_v12  ;;  %624 = vmatpush.bf16.msra.mxu2 %v603_v12 }
  0x1b   :  { %246 = vmatpush.bf16.msra.mxu1 %v611_v13  ;;  %632 = vmatpush.bf16.msra.mxu3 %v611_v13 }
  0x1e   :  { %219 = vmatpush.bf16.msra.mxu0 %v602_v14  ;;  %625 = vmatpush.bf16.msra.mxu2 %v602_v14 }
  0x1f   :  { %247 = vmatpush.bf16.msra.mxu1 %v610_v15  ;;  %633 = vmatpush.bf16.msra.mxu3 %v610_v15 }
  0x21   :  { %220 = vmatmul.bf16.vlgmr.msra.gmra.mxu0 %v511_v24  ;;  %230 = vmatmul.bf16.vlgmr.msra.gmra.mxu2 %v527_v25 }
  0x22   :  { %248 = vmatmul.bf16.vlgmr.msra.gmra.mxu1 %v515_v26  ;;  %258 = vmatmul.bf16.vlgmr.msra.gmra.mxu3 %v531_v27 }
  0x31   :  { %225 = vmatmul.bf16.gmra.mxu0 %v519_v35  ;;  %235 = vmatmul.bf16.gmra.mxu2 %v106_v36  ;;  %v656_v35 = vmov 64.0  }
  0x32   :  { %253 = vmatmul.bf16.gmra.mxu1 %v523_v37  ;;  %263 = vmatmul.bf16.gmra.mxu3 %v107_v38  ;;  %639 = vrcp.f32 %v656_v35 }
  0x38   :  { %v640_v36 = vpop.eup %639 }
  0x39   :  { %v327_v37 = vmul.f32 64.0, %v640_v36  ;;  %vm331_vm2 = vweird.f32 %v640_v36 }
  0x3b   :  { %v328_v38 = vsub.f32 1.0, %v327_v37 }
  0x3d   :  { %v329_v39 = vmul.f32 %v640_v36, %v328_v38 }
  0x9e   :  { %v221_v40 = vpop.f32.mrf.mxu0 }
  0x9f   :  { %v249_v42 = vpop.f32.mrf.mxu1 }
  0xa0   :  { %v250_v43 = vadd.f32 %v249_v42, %v221_v40  ;;  %v330_v40 = vadd.f32 %v640_v36, %v329_v39 }
  0xa2   :  { %v268_v44 = vadd.f32 %v250_v43, %v33_v41  ;;  %v801_v41 = vsel %vm331_vm2, %v640_v36, %v330_v40  ;;  %v861_v36 = vld [vmem:[%s925_s4] ss:$0 sm:$0xff] }
  0xa4   :  { %276 = vst.msk [vmem:[#allocation2] sm:$0xff] %vm24_vm0, %v268_v44  ;;  %v231_v45 = vpop.f32.mrf.mxu2 }
  0xa5   :  { %v259_v47 = vpop.f32.mrf.mxu3 }
  0xa6   :  { %v260_v48 = vadd.f32 %v259_v47, %v231_v45  ;;  %v223_v49 = vpop.f32.mrf.mxu0 }
  0xa7   :  { %v251_v51 = vpop.f32.mrf.mxu1 }
  0xa8   :  { %v272_v52 = vadd.f32 %v260_v48, %v37_v46  ;;  %v252_v53 = vadd.f32 %v251_v51, %v223_v49 }
  0xaa   :  { %280 = vst.msk [vmem:[#allocation2 + $0x20] sm:$0xff] %vm24_vm0, %v272_v52  ;;  %v269_v55 = vadd.f32 %v252_v53, %v34_v50 }
  0xab   :  { %v287_v56 = vld [vmem:[#allocation2] sm:$0xff] }
  0xac   :  { %277 = vst.msk [vmem:[#allocation2 + $0x8] sm:$0xff] %vm24_vm0, %v269_v55  ;;  %v233_v57 = vpop.f32.mrf.mxu2  ;;  %v787_v58 = vadd.f32 %v636_v54, %v287_v56 }
  0xad   :  { %v261_v60 = vpop.f32.mrf.mxu3 }
  0xae   :  { %v262_v61 = vadd.f32 %v261_v60, %v233_v57  ;;  %v226_v62 = vpop.f32.mrf.mxu0  ;;  %v305_v63 = vsel %vm24_vm0, %v787_v58, 0.0 }
  0xaf   :  { %v254_v1 = vpop.f32.mrf.mxu1  ;;  %306 = vadd.xlane.f32.xlu0 %v305_v63 }
  0xb0   :  { %v273_v2 = vadd.f32 %v262_v61, %v38_v59  ;;  %v255_v3 = vadd.f32 %v254_v1, %v226_v62 }
  0xb1   :  { %v291_v4 = vld [vmem:[#allocation2 + $0x20] sm:$0xff] }
  0xb2   :  { %281 = vst.msk [vmem:[#allocation2 + $0x28] sm:$0xff] %vm24_vm0, %v273_v2  ;;  %v270_v5 = vadd.f32 %v255_v3, %v35_v0  ;;  %v302_v6 = vadd.f32 %v636_v54, %v291_v4 }
  0xb3   :  { %v288_v7 = vld [vmem:[#allocation2 + $0x8] sm:$0xff] }
  0xb4   :  { %278 = vst.msk [vmem:[#allocation2 + $0x10] sm:$0xff] %vm24_vm0, %v270_v5  ;;  %v236_v8 = vpop.f32.mrf.mxu2  ;;  %v317_v9 = vsel %vm24_vm0, %v302_v6, 0.0  ;;  %v299_v10 = vadd.f32 %v636_v54, %v288_v7 }
  0xb5   :  { %v264_v12 = vpop.f32.mrf.mxu3  ;;  %318 = vadd.xlane.f32.xlu2 %v317_v9 }
  0xb6   :  { %v265_v13 = vadd.f32 %v264_v12, %v236_v8  ;;  %v228_v14 = vpop.f32.mrf.mxu0  ;;  %v308_v15 = vsel %vm24_vm0, %v299_v10, 0.0 }
  0xb7   :  { %v256_v17 = vpop.f32.mrf.mxu1  ;;  %309 = vadd.xlane.f32.xlu0 %v308_v15 }
  0xb8   :  { %v274_v18 = vadd.f32 %v265_v13, %v39_v11  ;;  %v257_v19 = vadd.f32 %v256_v17, %v228_v14 }
  0xb9   :  { %v292_v20 = vld [vmem:[#allocation2 + $0x28] sm:$0xff] }
  0xba   :  { %283 = vst.msk [vmem:[#allocation2 + $0x30] sm:$0x3] %vm31_vm1, %v274_v18  ;;  %v271_v21 = vadd.f32 %v257_v19, %v36_v16  ;;  %v303_v22 = vadd.f32 %v636_v54, %v292_v20 }
  0xbb   :  { %v289_v23 = vld [vmem:[#allocation2 + $0x10] sm:$0xff] }
  0xbc   :  { %279 = vst.msk [vmem:[#allocation2 + $0x18] sm:$0xff] %vm24_vm0, %v271_v21  ;;  %v320_v24 = vsel %vm24_vm0, %v303_v22, 0.0  ;;  %v238_v25 = vpop.f32.mrf.mxu2  ;;  %v300_v26 = vadd.f32 %v636_v54, %v289_v23 }
  0xbd   :  { %321 = vadd.xlane.f32.xlu2 %v320_v24  ;;  %v266_v27 = vpop.f32.mrf.mxu3 }
  0xbe   :  { %v311_v28 = vsel %vm24_vm0, %v300_v26, 0.0 }
  0xbf   :  { %312 = vadd.xlane.f32.xlu1 %v311_v28 }
  0xc1   :  { %v293_v29 = vld [vmem:[#allocation2 + $0x30] sm:$0x3] }
  0xc2   :  { %v304_v30 = vadd.f32 %v636_v54, %v293_v29 }
  0xc3   :  { %v290_v31 = vld [vmem:[#allocation2 + $0x18] sm:$0xff] }
  0xc4   :  { %v323_v32 = vsel %vm31_vm1, %v304_v30, 0.0  ;;  %v301_v33 = vadd.f32 %v636_v54, %v290_v31 }
  0xc5   :  { %324 = vadd.xlane.f32.xlu0 %v323_v32 }
  0xc6   :  { %v314_v34 = vsel %vm24_vm0, %v301_v33, 0.0 }
  0xc7   :  { %315 = vadd.xlane.f32.xlu1 %v314_v34 }
 0x122   :  { %v307_v42 = vpop.xlane.xlu0 %306 }
 0x123   :  { %v333_v43 = vmul.f32 %v801_v41, %v307_v42 }
 0x125   :  { %v805_v44 = vsub.f32 %v787_v58, %v333_v43 }
 0x127   :  { %v347_v45 = vmul.f32 %v805_v44, %v805_v44 }
 0x128   :  { %v319_v46 = vpop.xlane.xlu2 %318 }
 0x129   :  { %v354_v47 = vsel %vm24_vm0, %v347_v45, 0.0  ;;  %v337_v50 = vmul.f32 %v801_v41, %v319_v46 }
 0x12a   :  { %355 = vadd.xlane.f32.xlu1 %v354_v47  ;;  %v310_v48 = vpop.xlane.xlu0 %309 }
 0x12b   :  { %v334_v49 = vmul.f32 %v801_v41, %v310_v48  ;;  %v816_v53 = vsub.f32 %v302_v6, %v337_v50 }
 0x12d   :  { %v812_v51 = vsub.f32 %v299_v10, %v334_v49  ;;  %v351_v60 = vmul.f32 %v816_v53, %v816_v53 }
 0x12f   :  { %v348_v52 = vmul.f32 %v812_v51, %v812_v51  ;;  %v366_v0 = vsel %vm24_vm0, %v351_v60, 0.0 }
 0x130   :  { %v322_v55 = vpop.xlane.xlu2 %321 }
 0x131   :  { %v357_v54 = vsel %vm24_vm0, %v348_v52, 0.0  ;;  %v338_v58 = vmul.f32 %v801_v41, %v322_v55 }
 0x132   :  { %v313_v56 = vpop.xlane.xlu1 %312  ;;  %358 = vadd.xlane.f32.xlu2 %v357_v54 }
 0x133   :  { %v335_v57 = vmul.f32 %v801_v41, %v313_v56  ;;  %v827_v62 = vsub.f32 %v303_v22, %v338_v58 }
 0x135   :  { %v821_v59 = vsub.f32 %v300_v26, %v335_v57  ;;  %v352_v6 = vmul.f32 %v827_v62, %v827_v62 }
 0x137   :  { %v349_v61 = vmul.f32 %v821_v59, %v821_v59  ;;  %v369_v9 = vsel %vm24_vm0, %v352_v6, 0.0 }
 0x138   :  { %v325_v1 = vpop.xlane.xlu0 %324 }
 0x139   :  { %v360_v63 = vsel %vm24_vm0, %v349_v61, 0.0  ;;  %v339_v4 = vmul.f32 %v801_v41, %v325_v1 }
 0x13a   :  { %v316_v2 = vpop.xlane.xlu1 %315  ;;  %361 = vadd.xlane.f32.xlu0 %v360_v63  ;;  %367 = vadd.xlane.f32.xlu2 %v366_v0 }
 0x13b   :  { %v336_v3 = vmul.f32 %v801_v41, %v316_v2  ;;  %v839_v8 = vsub.f32 %v304_v30, %v339_v4 }
 0x13d   :  { %v833_v5 = vsub.f32 %v301_v33, %v336_v3  ;;  %v353_v11 = vmul.f32 %v839_v8, %v839_v8  ;;  %v855_v33 = vld [vmem:[%s924_s3] ss:$0 sm:$0xff] }
 0x13f   :  { %v350_v7 = vmul.f32 %v833_v5, %v833_v5  ;;  %v372_v12 = vsel %vm31_vm1, %v353_v11, 0.0 }
 0x141   :  { %v363_v10 = vsel %vm24_vm0, %v350_v7, 0.0 }
 0x142   :  { %370 = vadd.xlane.f32.xlu0 %v369_v9  ;;  %364 = vadd.xlane.f32.xlu1 %v363_v10 }
 0x14a   :  { %373 = vadd.xlane.f32.xlu1 %v372_v12 }
 0x19d   :  { %v356_v13 = vpop.xlane.xlu1 %355 }
 0x19e   :  { %v375_v14 = vmul.f32 %v356_v13, %v801_v41 }
 0x1a0   :  { %v382_v15 = vadd.f32 1e-05, %v375_v14 }
 0x1a2   :  { %641 = vrsqrt.f32 %v382_v15  ;;  %vm395_vm4 = vweird.f32 %v382_v15 }
 0x1a5   :  { %v359_v16 = vpop.xlane.xlu2 %358 }
 0x1a6   :  { %v376_v17 = vmul.f32 %v359_v16, %v801_v41 }
 0x1a8   :  { %v642_v18 = vpop.eup %641  ;;  %v383_v19 = vadd.f32 1e-05, %v376_v17 }
 0x1a9   :  { %v390_v20 = vmul.f32 %v642_v18, %v382_v15  ;;  %vm396_vm3 = vweird.f32 %v642_v18 }
 0x1aa   :  { %643 = vrsqrt.f32 %v383_v19  ;;  %vm397_vm5 = vmor %vm395_vm4, %vm396_vm3  ;;  %vm405_vm8 = vweird.f32 %v383_v19 }
 0x1ab   :  { %v391_v21 = vmul.f32 %v642_v18, %v390_v20 }
 0x1ad   :  { %v392_v22 = vmul.f32 0.5, %v391_v21  ;;  %v368_v23 = vpop.xlane.xlu2 %367  ;;  %v362_v24 = vpop.xlane.xlu0 %361 }
 0x1ae   :  { %v379_v25 = vmul.f32 %v368_v23, %v801_v41  ;;  %v377_v26 = vmul.f32 %v362_v24, %v801_v41 }
 0x1af   :  { %v393_v27 = vsub.f32 1.5, %v392_v22 }
 0x1b0   :  { %v644_v28 = vpop.eup %643  ;;  %v386_v29 = vadd.f32 1e-05, %v379_v25  ;;  %v850_v30 = vadd.f32 1e-05, %v377_v26 }
 0x1b1   :  { %v394_v31 = vmul.f32 %v642_v18, %v393_v27  ;;  %v400_v32 = vmul.f32 %v644_v28, %v383_v19  ;;  %vm406_vm6 = vweird.f32 %v644_v28 }
 0x1b2   :  { %645 = vrsqrt.f32 %v386_v29  ;;  %vm407_vm9 = vmor %vm405_vm8, %vm406_vm6  ;;  %vm435_vm12 = vweird.f32 %v386_v29  ;;  %vm415_vm14 = vweird.f32 %v850_v30 }
 0x1b3   :  { %v398_v34 = vsel %vm397_vm5, %v642_v18, %v394_v31  ;;  %v401_v35 = vmul.f32 %v644_v28, %v400_v32  ;;  %647 = vrsqrt.f32 %v850_v30 }
 0x1b4   :  { %v459_v37 = vmul.f32 %v398_v34, %v805_v44 }
 0x1b5   :  { %v402_v38 = vmul.f32 0.5, %v401_v35  ;;  %v365_v39 = vpop.xlane.xlu1 %364  ;;  %v371_v40 = vpop.xlane.xlu0 %370 }
 0x1b6   :  { %v470_v42 = vmul.f32 %v855_v33, %v459_v37  ;;  %v378_v43 = vmul.f32 %v365_v39, %v801_v41  ;;  %v380_v45 = vmul.f32 %v371_v40, %v801_v41 }
 0x1b7   :  { %v403_v46 = vsub.f32 1.5, %v402_v38 }
 0x1b8   :  { %v646_v47 = vpop.eup %645  ;;  %v481_v48 = vadd.f32 %v861_v36, %v470_v42  ;;  %v385_v49 = vadd.f32 1e-05, %v378_v43  ;;  %v868_v50 = vadd.f32 1e-05, %v380_v45 }
 0x1b9   :  { %v648_v52 = vpop.eup %647  ;;  %v404_v44 = vmul.f32 %v644_v28, %v403_v46  ;;  %v430_v54 = vmul.f32 %v646_v47, %v386_v29  ;;  %vm436_vm10 = vweird.f32 %v646_v47 }
 0x1ba   :  { %v488_v55 = vpack.c.bf16 %v481_v48, %v481_v48  ;;  %v410_v56 = vmul.f32 %v648_v52, %v850_v30  ;;  %649 = vrsqrt.f32 %v385_v49  ;;  %vm416_vm11 = vweird.f32 %v648_v52  ;;  %vm437_vm13 = vmor %vm435_vm12, %vm436_vm10 }
 0x1bb   :  { %v408_v57 = vsel %vm407_vm9, %v644_v28, %v404_v44  ;;  %v431_v58 = vmul.f32 %v646_v47, %v430_v54  ;;  %651 = vrsqrt.f32 %v868_v50  ;;  %vm417_vm15 = vmor %vm415_vm14, %vm416_vm11  ;;  %vm425_vm2 = vweird.f32 %v385_v49 }
 0x1bc   :  { %496 = vst.msk [vmem:[%s926_s5] sm:$0xf] %vm495_vm7, %v488_v55  ;;  %v460_v60 = vmul.f32 %v408_v57, %v812_v51  ;;  %v411_v61 = vmul.f32 %v648_v52, %v410_v56  ;;  %vm445_vm4 = vweird.f32 %v868_v50  ;;  %vm502_vm10 = vcmask 516096  }
 0x1bd   :  { %v432_v63 = vmul.f32 0.5, %v431_v58  ;;  %v374_v0 = vpop.xlane.xlu1 %373 }
 0x1be   :  { %v471_v1 = vmul.f32 %v855_v33, %v460_v60  ;;  %v412_v2 = vmul.f32 0.5, %v411_v61  ;;  %v381_v3 = vmul.f32 %v374_v0, %v801_v41 }
 0x1bf   :  { %v433_v4 = vsub.f32 1.5, %v432_v63 }
 0x1c0   :  { %v650_v6 = vpop.eup %649  ;;  %v482_v7 = vadd.f32 %v861_v36, %v471_v1  ;;  %v413_v9 = vsub.f32 1.5, %v412_v2  ;;  %v388_v10 = vadd.f32 1e-05, %v381_v3 }
 0x1c1   :  { %v652_v11 = vpop.eup %651  ;;  %v434_v12 = vmul.f32 %v646_v47, %v433_v4  ;;  %v420_v51 = vmul.f32 %v650_v6, %v385_v49  ;;  %vm426_vm0 = vweird.f32 %v650_v6 }
 0x1c2   :  { %v489_v13 = vpack.c.bf16 %v482_v7, %v482_v7  ;;  %v414_v14 = vmul.f32 %v648_v52, %v413_v9  ;;  %v440_v15 = vmul.f32 %v652_v11, %v868_v50  ;;  %653 = vrsqrt.f32 %v388_v10  ;;  %vm427_vm3 = vmor %vm425_vm2, %vm426_vm0 }
 0x1c3   :  { %v438_v41 = vsel %vm437_vm13, %v646_v47, %v434_v12  ;;  %v421_v16 = vmul.f32 %v650_v6, %v420_v51  ;;  %vm446_vm1 = vweird.f32 %v652_v11  ;;  %vm455_vm8 = vweird.f32 %v388_v10 }
 0x1c4   :  { %497 = vst.msk [vmem:[%s926_s5 + $0x4] sm:$0xf] %vm495_vm7, %v489_v13  ;;  %v463_v17 = vmul.f32 %v438_v41, %v816_v53  ;;  %v418_v18 = vsel %vm417_vm15, %v648_v52, %v414_v14  ;;  %v441_v19 = vmul.f32 %v652_v11, %v440_v15  ;;  %vm447_vm5 = vmor %vm445_vm4, %vm446_vm1 }
 0x1c5   :  { %v461_v20 = vmul.f32 %v418_v18, %v821_v59  ;;  %v422_v21 = vmul.f32 0.5, %v421_v16 }
 0x1c6   :  { %v474_v22 = vmul.f32 %v855_v33, %v463_v17  ;;  %v442_v23 = vmul.f32 0.5, %v441_v19 }
 0x1c7   :  { %v472_v24 = vmul.f32 %v855_v33, %v461_v20  ;;  %v423_v25 = vsub.f32 1.5, %v422_v21 }
 0x1c8   :  { %v485_v26 = vadd.f32 %v861_v36, %v474_v22  ;;  %v443_v27 = vsub.f32 1.5, %v442_v23  ;;  %v654_v28 = vpop.eup %653 }
 0x1c9   :  { %v483_v29 = vadd.f32 %v861_v36, %v472_v24  ;;  %v424_v53 = vmul.f32 %v650_v6, %v423_v25  ;;  %v450_v31 = vmul.f32 %v654_v28, %v388_v10  ;;  %vm456_vm6 = vweird.f32 %v654_v28 }
 0x1ca   :  { %v492_v30 = vpack.c.bf16 %v485_v26, %v485_v26  ;;  %v444_v59 = vmul.f32 %v652_v11, %v443_v27  ;;  %vm457_vm9 = vmor %vm455_vm8, %vm456_vm6 }
 0x1cb   :  { %v490_v32 = vpack.c.bf16 %v483_v29, %v483_v29  ;;  %v428_v34 = vsel %vm427_vm3, %v650_v6, %v424_v53  ;;  %v451_v38 = vmul.f32 %v654_v28, %v450_v31 }
 0x1cc   :  { %500 = vst.msk [vmem:[%s926_s5 + $0x10] sm:$0xf] %vm495_vm7, %v492_v30  ;;  %v462_v35 = vmul.f32 %v428_v34, %v833_v5  ;;  %v448_v37 = vsel %vm447_vm5, %v652_v11, %v444_v59 }
 0x1cd   :  { %498 = vst.msk [vmem:[%s926_s5 + $0x8] sm:$0xf] %vm495_vm7, %v490_v32  ;;  %v464_v39 = vmul.f32 %v448_v37, %v827_v62  ;;  %v452_v42 = vmul.f32 0.5, %v451_v38 }
 0x1ce   :  { %v473_v40 = vmul.f32 %v855_v33, %v462_v35 }
 0x1cf   :  { %v475_v43 = vmul.f32 %v855_v33, %v464_v39  ;;  %v453_v46 = vsub.f32 1.5, %v452_v42 }
 0x1d0   :  { %v484_v45 = vadd.f32 %v861_v36, %v473_v40 }
 0x1d1   :  { %v486_v5 = vadd.f32 %v861_v36, %v475_v43  ;;  %v454_v48 = vmul.f32 %v654_v28, %v453_v46 }
 0x1d2   :  { %v491_v47 = vpack.c.bf16 %v484_v45, %v484_v45 }
 0x1d3   :  { %v493_v49 = vpack.c.bf16 %v486_v5, %v486_v5  ;;  %v458_v62 = vsel %vm457_vm9, %v654_v28, %v454_v48 }
 0x1d4   :  { %499 = vst.msk [vmem:[%s926_s5 + $0xc] sm:$0xf] %vm495_vm7, %v491_v47  ;;  %v465_v50 = vmul.f32 %v458_v62, %v839_v8 }
 0x1d5   :  { %501 = vst.msk [vmem:[%s926_s5 + $0x14] sm:$0xf] %vm495_vm7, %v493_v49 }
 0x1d6   :  { %v476_v52 = vmul.f32 %v855_v33, %v465_v50 }
 0x1d8   :  { %v487_v44 = vadd.f32 %v861_v36, %v476_v52 }
 0x1da   :  { %v494_v54 = vpack.c.bf16 %v487_v44, %v487_v44 }
 0x1dc   :  { %503 = vst.msk [vmem:[%s926_s5 + $0x18] sm:$0x1] %vm502_vm10, %v494_v54 }

// kernel: pvt_attention_forward.7
= control target key start
LH: loop header
LB: loop body
LE: loop exit
PB: predicated region body
PF: predicated region fallthrough
CT: control target
= control target key end

     0   :  { %9 = vsyncpa [#allocation4], 0  ;;  %s1579_s0 = inlined_call_operand.vmem [shape: bf16[2,64,64], index: 0, kind: input, shape index: {}]   ;;  %s1580_s1 = inlined_call_operand.vmem [shape: bf16[2,25,128], index: 1, kind: input, shape index: {}]   ;;  %s1581_s2 = inlined_call_operand.vmem [shape: bf16[64,64], index: 2, kind: input, shape index: {}]   ;;  %s1582_s3 = inlined_call_operand.vmem [shape: f32[1,64], index: 3, kind: input, shape index: {}]   ;;  %s1583_s4 = inlined_call_operand.hbm [shape: f32[2,64,64], index: 4, kind: output, shape index: {}]  }
   0x1   :  { %11 = vsyncpa [#allocation4 + $0x1], 0  ;;  %s1271_s15 = smov 0   ;;  %s1273_s16 = smov 0  }
   0x2   :  { %s1275_s17 = smov 0   ;;  %s1277_s18 = smov 0  }
   0x3   :  { %s1279_s19 = smov 0   ;;  %s1281_s20 = smov 0  }
   0x4 LB: > { %s940_s21 = sadd.s32 4294967295, %s1238_s20   ;;  %s941_s22 = sadd.s32 4294967294, %s1238_s20   ;;  %s1238_s20 = sphi %s1281_s20, %s17_s20   ;;  %s1234_s19 = sphi %s1279_s19, %s1590_s19   ;;  %s1230_s18 = sphi %s1277_s18, %s1589_s18   ;;  %s1226_s17 = sphi %s1275_s17, %s1588_s17   ;;  %s1222_s16 = sphi %s1273_s16, %s1587_s16   ;;  %s1218_s15 = sphi %s1271_s15, %s1586_s15  }
   0x5   : > { %s29_s23 = sadd.s32 1, %s1234_s19  ;;  %s134_s24 = sadd.s32 1, %s1226_s17 }
   0x6   : > { %p31_p0 = scmp.ge.s32.totalorder %s29_s23, 2  ;;  %p144_p1 = scmp.ne.s32.totalorder %s1226_s17, %s1222_s16 }
   0x7   : > { %p145_p2 = scmp.eq.s32.totalorder %s940_s21, 1  ;;  %p150_p3 = scmp.ne.s32.totalorder %s1222_s16, %s1218_s15 }
   0x8   : > { %s1592_s23 = smov (%p31_p0, %s29_s23), 0  ;;  %p151_p5 = scmp.eq.s32.totalorder %s941_s22, 1 }
   0x9   : > { %p1311_p4 = por %p145_p2, %p144_p1  ;;  %s129_s26 = ssub.s32 %s1234_s19, %s1592_s23 }
   0xa   : > { %p944_p6 = scmp.ge.s32.totalorder %s1238_s20, 1  ;;  %p132_p7 = scmp.eq.s32.totalorder %s129_s26, 0 }
   0xb   : > { %p1318_p8 = por %p151_p5, %p150_p3  ;;  %p196_p9 = scmp.lt.s32.totalorder %s1238_s20, 3 }
   0xc   : > { %s1324_s28 = scalar_select %p132_p7, %s1226_s17, %s134_s24  }
   0xd   : > { %p197_p10 = pnand %p944_p6, %p196_p9 }
   0xe   : > { %p232_p11 = scmp.lt.s32.totalorder (!%p197_p10), %s1230_s18, 1  ;;  %s1240_s12 = smov (!%p197_p10), 64  }
   0xf   : > { %200 = sbr.rel (%p197_p10) target bundleno = 1338 (0x53a), region = 36  ;;  %s1241_s13 = smov (!%p197_p10), 96  }
  0x10   : > { %s1243_s14 = smov (!%p197_p10), 32   ;;  %s1180_s6 = scalar_lea.hbm (!%p197_p10), %s1583_s4, 128 }
  0x14   : > { %s233_s29 = scalar_select %p232_p11, %s1230_s18, 1  ;;  %vm290_vm0 = vcmask 261120   ;;  %vm338_vm1 = vcmask 203776   ;;  %vm448_vm2 = vcmask 1043456   ;;  %vm449_vm3 = vcmask 1044480  }
  0x15   : > { %v1242_v34 = vmov 65535   ;;  %vm724_vm4 = vcmask 523520   ;;  %vm781_vm5 = vcmask 523264  }
  0x16   : > { %s1016_s30 = sshll.u32 %s233_s29, 4  ;;  %s1015_s8 = sshll.u32 %s233_s29, 5  ;;  %v450_v35 = vsel %vm448_vm2, 4294967295, %v1242_v34 }
  0x17   : > { %s245_s7 = scalar_lea.vmem %s1580_s1, %s1016_s30  ;;  %s239_s11 = scalar_lea.vmem %s1579_s0, %s1015_s8  ;;  %v1366_v36 = vsel %vm449_vm3, %v450_v35, 0 }
  0x18   : > { %v972_v0 = vld [vmem:[%s245_s7 + $0x8] sm:$0xf]  ;;  %v1022_v1 = vld [vmem:[%s245_s7 + $0x8] sm:$0x10]  ;;  %v1335_v4 = vld [vmem:[%s245_s7] sm:$0xff]  ;;  %s228_s7 = sand.u32 1, %s1222_s16  }
  0x19   : > { %v1331_v2 = vor.u32 %v1022_v1, %v972_v0  ;;  %v304_v5 = vsel %vm290_vm0, %v1335_v4, 0  ;;  %v1017_v6 = vld [vmem:[%s239_s11] sm:$0xff]  ;;  %v1018_v7 = vld [vmem:[%s239_s11 + $0x8] sm:$0xff]  ;;  %v1019_v8 = vld [vmem:[%s239_s11 + $0x10] sm:$0xff]  ;;  %s945_s8 = sshll.u32 %s228_s7, 6  ;;  %s832_s26 = scalar_lea.sflag [#allocation4], %s228_s7 }
  0x1a   : > { %v1020_v11 = vld [vmem:[%s239_s11 + $0x18] sm:$0xff]  ;;  %s230_s11 = scalar_lea.vmem [#allocation3], %s945_s8 }
  0x1b   : > { %v307_v3 = vsel %vm290_vm0, %v1331_v2, 0  ;;  %433 = vrot.lane.b32.xlu2 %v1331_v2, %s1240_s12  ;;  %s846_s22 = sshll.u32 %s230_s11, 4  ;;  %s847_s22 = int_to_ptr.vmem [resolvable:$true] %s846_s22 }
  0x1c   : > { %315 = vmatpush.bf16.xpose.msra.mxu0 %v307_v3 }
  0x23   : > { %431 = vrot.lane.b32.xlu2 %v1335_v4, %s1240_s12  ;;  %s1027_s12 = sshll.u32 %s1230_s18, 6 }
  0x24   : > { %316 = vmatpush.bf16.xpose.msra.mxu0 %v304_v5  ;;  %s845_s21 = scalar_lea.hbm %s1583_s4, %s1027_s12 }
  0x25   : > { %s848_s24 = sshll.u32 %s845_s21, 4  ;;  %s849_s24 = int_to_ptr.hbm [resolvable:$true] %s848_s24 }
  0x26   : > { %s1174_s18 = sshra.s32 %s849_s24, 4  ;;  %s1175_s18 = int_to_ptr.hbm [resolvable:$true] %s1174_s18 }
  0x27   : > { %s1176_s29 = scalar_lea.hbm %s1175_s18, 64  ;;  %p1181_p1 = scmp.lt.s32.totalorder %s1175_s18, %s1583_s4 }
  0x28   : > { %p1177_p12 = scmp.ne.s32.totalorder %s1175_s18, %s1176_s29  ;;  %p1182_p2 = scmp.lt.s32.totalorder %s1180_s6, %s1176_s29 }
  0x2a   : > { %p1178_p13 = pnand %p1177_p12, %p1311_p4  ;;  %p1183_p3 = por %p1182_p2, %p1181_p1 }
  0x2b   : > { %974 = vmatmul.msk.bf16.vlgmr.msra.gmra.mxu0 %vm290_vm0, %v1017_v6  ;;  %492 = vrot.lane.b32.xlu2 %v1017_v6, %s1241_s13 }
  0x2c   : > { %p1179_p0 = pneg %p1178_p13 }
  0x2e   : > { %p1184_p5 = pnand %p1183_p3, %p1179_p0 }
  0x33   : > { %494 = vrot.lane.b32.xlu2 %v1018_v7, %s1241_s13 }
  0x3b   : > { %975 = vmatmul.msk.bf16.gmra.mxu0 %vm290_vm0, %v1018_v7  ;;  %496 = vrot.lane.b32.xlu2 %v1019_v8, %s1241_s13 }
  0x4b   : > { %976 = vmatmul.msk.bf16.gmra.mxu0 %vm290_vm0, %v1019_v8 }
  0x5b   : > { %977 = vmatmul.msk.bf16.gmra.mxu0 %vm290_vm0, %v1020_v11 }
  0x75   : > { %v434_v33 = vpop.permute.xlu2 %433 }
  0x76   : > { %v453_v37 = vand.u32 %v1366_v36, %v434_v33 }
  0x78   : > { %1029 = vmatpush.bf16.msra.mxu2 %v453_v37  ;;  %1028 = vmatpush.bf16.msra.mxu1 %v453_v37 }
  0x79   : > { %1030 = vmatpush.bf16.msra.mxu3 %v453_v37  ;;  %461 = vmatpush.bf16.msrb.mxu0 %v453_v37 }
  0x7d   : > { %v432_v38 = vpop.permute.xlu2 %431 }
  0x7e   : > { %1032 = vmatpush.bf16.msra.mxu2 %v432_v38  ;;  %1031 = vmatpush.bf16.msra.mxu1 %v432_v38 }
  0x7f   : > { %462 = vmatpush.bf16.msrb.mxu0 %v432_v38  ;;  %1033 = vmatpush.bf16.msra.mxu3 %v432_v38 }
  0x85   : > { %v493_v50 = vpop.permute.xlu2 %492 }
  0x8d   : > { %v495_v51 = vpop.permute.xlu2 %494 }
  0x95   : > { %v497_v52 = vpop.permute.xlu2 %496 }
  0xa8   : > { %v1347_v9 = vpop.f32.mrf.mxu0 }
  0xa9   : > { %v339_v32 = vsel %vm338_vm1, %v1347_v9, -inf }
  0xb0   : > { %v1349_v10 = vpop.f32.mrf.mxu0 }
  0xb1   : > { %v342_v8 = vsel %vm338_vm1, %v1349_v10, -inf }
  0xb8   : > { %v1352_v12 = vpop.f32.mrf.mxu0 }
  0xc0   : > { %v1354_v13 = vpop.f32.mrf.mxu0 }
  0xc8   : > { %v328_v14 = vpop.f32.mrf.mxu0 }
  0xc9   : > { %v351_v15 = vsel %vm338_vm1, %v328_v14, -inf }
  0xca   : > { %352 = vmax.xlane.f32.xlu0 %v351_v15 }
  0xd0   : > { %v330_v16 = vpop.f32.mrf.mxu0 }
  0xd1   : > { %v354_v17 = vsel %vm338_vm1, %v330_v16, -inf }
  0xd2   : > { %355 = vmax.xlane.f32.xlu0 %v354_v17 }
  0xd8   : > { %v333_v26 = vpop.f32.mrf.mxu0 }
  0xd9   : > { %v357_v27 = vsel %vm338_vm1, %v333_v26, -inf }
  0xda   : > { %358 = vmax.xlane.f32.xlu2 %v357_v27 }
  0xe0   : > { %v335_v30 = vpop.f32.mrf.mxu0 }
  0xe1   : > { %v360_v31 = vsel %vm338_vm1, %v335_v30, -inf }
  0xe6   : > { %502 = vrot.lane.b32.xlu0 %v1331_v2, %s1241_s13 }
  0xee   : > { %498 = vrot.lane.b32.xlu0 %v1020_v11, %s1241_s13 }
 0x13d   : > { %v353_v18 = vpop.xlane.xlu0 %352 }
 0x13e   : > { %v367_v19 = vsub.f32 %v328_v14, %v353_v18  ;;  %v345_v18 = vsel %vm338_vm1, %v1352_v12, -inf }
 0x140   : > { %v379_v20 = vmul.f32 1.442695, %v367_v19 }
 0x142   : > { %1096 = vpow2.f32 %v379_v20 }
 0x145   : > { %v356_v21 = vpop.xlane.xlu0 %355 }
 0x146   : > { %v368_v22 = vsub.f32 %v330_v16, %v356_v21 }
 0x148   : > { %v1097_v23 = vpop.eup %1096  ;;  %v381_v24 = vmul.f32 1.442695, %v368_v22 }
 0x149   : > { %v399_v25 = vsel %vm338_vm1, %v1097_v23, 0.0 }
 0x14a   : > { %1098 = vpow2.f32 %v381_v24  ;;  %400 = vadd.xlane.f32.xlu1 %v399_v25 }
 0x14d   : > { %v359_v56 = vpop.xlane.xlu2 %358 }
 0x14e   : > { %v369_v57 = vsub.f32 %v333_v26, %v359_v56  ;;  %v348_v26 = vsel %vm338_vm1, %v1354_v13, -inf }
 0x150   : > { %v1099_v28 = vpop.eup %1098  ;;  %v383_v58 = vmul.f32 1.442695, %v369_v57 }
 0x151   : > { %v402_v29 = vsel %vm338_vm1, %v1099_v28, 0.0 }
 0x152   : > { %403 = vadd.xlane.f32.xlu1 %v402_v29 }
 0x158   : > { %v503_v39 = vpop.permute.xlu0 %502 }
 0x159   : > { %v520_v40 = vsel %vm290_vm0, %v503_v39, 0 }
 0x15a   : > { %528 = vmatpush.bf16.xpose.msrb.mxu2 %v520_v40 }
 0x160   : > { %v499_v53 = vpop.permute.xlu0 %498 }
 0x16b   : > { %500 = vrot.lane.b32.xlu1 %v1335_v4, %s1241_s13 }
 0x195   : > { %361 = vmax.xlane.f32.xlu1 %v360_v31 }
 0x19d   : > { %340 = vmax.xlane.f32.xlu1 %v339_v32 }
 0x1bd   : > { %v401_v41 = vpop.xlane.xlu1 %400 }
 0x1be   : > { %1100 = vrcp.f32 %v401_v41 }
 0x1c4   : > { %v1101_v43 = vpop.eup %1100 }
 0x1c5   : > { %v404_v42 = vpop.xlane.xlu1 %403  ;;  %v423_v45 = vmul.f32 %v1101_v43, %v1097_v23 }
 0x1c6   : > { %1102 = vrcp.f32 %v404_v42 }
 0x1c7   : > { %1104 = vpow2.f32 %v383_v58 }
 0x1cc   : > { %v1103_v44 = vpop.eup %1102 }
 0x1cd   : > { %v424_v46 = vmul.f32 %v1103_v44, %v1099_v28  ;;  %v1379_v0 = vpop.eup %1104 }
 0x1ce   : > { %v405_v5 = vsel %vm338_vm1, %v1379_v0, 0.0 }
 0x1cf   : > { %v429_v47 = vpack.c.bf16 %v424_v46, %v423_v45 }
 0x1d1   : > { %980 = vmatmul.msk.bf16.vlgmr.msra.gmra.mxu2 %vm338_vm1, %v429_v47 }
 0x1dd   : > { %v501_v48 = vpop.permute.xlu1 %500 }
 0x1de   : > { %v517_v49 = vsel %vm290_vm0, %v501_v48, 0 }
 0x1df   : > { %529 = vmatpush.bf16.xpose.msrb.mxu2 %v517_v49 }
 0x1e6   : > { %982 = vmatmul.msk.bf16.vlgmr.msrb.gmra.mxu2 %vm290_vm0, %v493_v50 }
 0x1f6   : > { %983 = vmatmul.msk.bf16.gmra.mxu2 %vm290_vm0, %v495_v51 }
 0x206   : > { %984 = vmatmul.msk.bf16.gmra.mxu2 %vm290_vm0, %v497_v52 }
 0x208   : > { %v362_v59 = vpop.xlane.xlu1 %361 }
 0x209   : > { %v370_v61 = vsub.f32 %v335_v30, %v362_v59 }
 0x20b   : > { %v385_v63 = vmul.f32 1.442695, %v370_v61 }
 0x20d   : > { %1106 = vpow2.f32 %v385_v63 }
 0x210   : > { %v1408_v30 = vpop.xlane.xlu1 %340 }
 0x213   : > { %v1107_v6 = vpop.eup %1106 }
 0x214   : > { %v408_v14 = vsel %vm338_vm1, %v1107_v6, 0.0 }
 0x216   : > { %985 = vmatmul.msk.bf16.gmra.mxu2 %vm290_vm0, %v499_v53 }
 0x254   : > { %v474_v54 = vpop.f32.mrf.mxu2 }
 0x255   : > { %488 = vst.msk [vmem:[#allocation2 + $0x20] sm:$0xff] %vm290_vm0, %v474_v54 }
 0x25c   : > { %v476_v55 = vpop.f32.mrf.mxu2 }
 0x25d   : > { %489 = vst.msk [vmem:[#allocation2 + $0x28] sm:$0xff] %vm290_vm0, %v476_v55 }
 0x269   : > { %v531_v60 = vpop.f32.mrf.mxu2 }
 0x26a   : > { %v551_v62 = vsel %vm338_vm1, %v531_v60, -inf }
 0x26b   : > { %552 = vmax.xlane.f32.xlu0 %v551_v62 }
 0x271   : > { %v533_v1 = vpop.f32.mrf.mxu2 }
 0x272   : > { %v554_v3 = vsel %vm338_vm1, %v533_v1, -inf }
 0x273   : > { %555 = vmax.xlane.f32.xlu2 %v554_v3  ;;  %406 = vadd.xlane.f32.xlu0 %v405_v5 }
 0x279   : > { %v536_v7 = vpop.f32.mrf.mxu2 }
 0x27a   : > { %v557_v11 = vsel %vm338_vm1, %v536_v7, -inf }
 0x27b   : > { %343 = vmax.xlane.f32.xlu0 %v342_v8  ;;  %558 = vmax.xlane.f32.xlu1 %v557_v11 }
 0x27c   : > { %409 = vadd.xlane.f32.xlu2 %v408_v14 }
 0x281   : > { %v538_v15 = vpop.f32.mrf.mxu2 }
 0x282   : > { %v560_v16 = vsel %vm338_vm1, %v538_v15, -inf }
 0x283   : > { %561 = vmax.xlane.f32.xlu0 %v560_v16 }
 0x289   : > { %v541_v17 = vpop.f32.mrf.mxu2 }
 0x28a   : > { %v563_v19 = vsel %vm338_vm1, %v541_v17, -inf }
 0x28b   : > { %346 = vmax.xlane.f32.xlu0 %v345_v18  ;;  %564 = vmax.xlane.f32.xlu2 %v563_v19 }
 0x291   : > { %v1392_v20 = vpop.f32.mrf.mxu2 }
 0x292   : > { %v566_v21 = vsel %vm338_vm1, %v1392_v20, -inf }
 0x293   : > { %567 = vmax.xlane.f32.xlu1 %v566_v21 }
 0x299   : > { %v1396_v22 = vpop.f32.mrf.mxu2 }
 0x29a   : > { %v569_v23 = vsel %vm338_vm1, %v1396_v22, -inf }
 0x29b   : > { %570 = vmax.xlane.f32.xlu2 %v569_v23 }
 0x2a1   : > { %v1400_v24 = vpop.f32.mrf.mxu2 }
 0x2a2   : > { %v572_v25 = vsel %vm338_vm1, %v1400_v24, -inf }
 0x2a3   : > { %573 = vmax.xlane.f32.xlu1 %v572_v25  ;;  %349 = vmax.xlane.f32.xlu2 %v348_v26 }
 0x2bc   : > { %645 = vrot.lane.b32.xlu1 %v1331_v2, %s1243_s14 }
 0x2de   : > { %v553_v27 = vpop.xlane.xlu0 %552 }
 0x2df   : > { %v575_v28 = vsub.f32 %v531_v60, %v553_v27 }
 0x2e1   : > { %v583_v29 = vmul.f32 1.442695, %v575_v28 }
 0x2e3   : > { %1108 = vpow2.f32 %v583_v29 }
 0x2e6   : > { %v407_v31 = vpop.xlane.xlu0 %406  ;;  %v556_v32 = vpop.xlane.xlu2 %555 }
 0x2e7   : > { %v576_v33 = vsub.f32 %v533_v1, %v556_v32 }
 0x2e9   : > { %v1410_v34 = vpop.eup %1108  ;;  %v585_v35 = vmul.f32 1.442695, %v576_v33 }
 0x2ea   : > { %v599_v37 = vsel %vm338_vm1, %v1410_v34, 0.0 }
 0x2eb   : > { %1110 = vpow2.f32 %v585_v35  ;;  %600 = vadd.xlane.f32.xlu0 %v599_v37 }
 0x2ec   : > { %1112 = vrcp.f32 %v407_v31 }
 0x2ee   : > { %v344_v38 = vpop.xlane.xlu0 %343  ;;  %v559_v2 = vpop.xlane.xlu1 %558 }
 0x2ef   : > { %v410_v39 = vpop.xlane.xlu2 %409  ;;  %v577_v40 = vsub.f32 %v536_v7, %v559_v2  ;;  %v364_v53 = vsub.f32 %v1349_v10, %v344_v38 }
 0x2f0   : > { %1114 = vrcp.f32 %v410_v39 }
 0x2f1   : > { %v1414_v41 = vpop.eup %1110  ;;  %v587_v42 = vmul.f32 1.442695, %v577_v40  ;;  %v373_v55 = vmul.f32 1.442695, %v364_v53 }
 0x2f2   : > { %v602_v43 = vsel %vm338_vm1, %v1414_v41, 0.0  ;;  %v1113_v44 = vpop.eup %1112 }
 0x2f3   : > { %603 = vadd.xlane.f32.xlu2 %v602_v43  ;;  %1116 = vpow2.f32 %v587_v42  ;;  %v425_v48 = vmul.f32 %v1113_v44, %v1379_v0 }
 0x2f6   : > { %v1115_v45 = vpop.eup %1114  ;;  %v562_v46 = vpop.xlane.xlu0 %561 }
 0x2f7   : > { %v578_v47 = vsub.f32 %v538_v15, %v562_v46  ;;  %v426_v49 = vmul.f32 %v1115_v45, %v1107_v6  ;;  %v363_v15 = vsub.f32 %v1347_v9, %v1408_v30 }
 0x2f9   : > { %v589_v50 = vmul.f32 1.442695, %v578_v47  ;;  %v430_v51 = vpack.c.bf16 %v426_v49, %v425_v48  ;;  %v1419_v52 = vpop.eup %1116  ;;  %v371_v25 = vmul.f32 1.442695, %v363_v15 }
 0x2fa   : > { %v605_v54 = vsel %vm338_vm1, %v1419_v52, 0.0 }
 0x2fb   : > { %1118 = vpow2.f32 %v589_v50  ;;  %981 = vmatmul.msk.bf16.vlgmr.msra.gmra.mxu3 %vm338_vm1, %v430_v51  ;;  %606 = vadd.xlane.f32.xlu2 %v605_v54 }
 0x2fc   : > { %1120 = vpow2.f32 %v373_v55 }
 0x2fe   : > { %v565_v56 = vpop.xlane.xlu2 %564  ;;  %v347_v16 = vpop.xlane.xlu0 %346 }
 0x2ff   : > { %v579_v57 = vsub.f32 %v541_v17, %v565_v56  ;;  %643 = vrot.lane.b32.xlu0 %v1335_v4, %s1243_s14 }
 0x301   : > { %v1427_v58 = vpop.eup %1118  ;;  %v591_v59 = vmul.f32 1.442695, %v579_v57 }
 0x302   : > { %v608_v10 = vsel %vm338_vm1, %v1427_v58, 0.0  ;;  %v1432_v62 = vpop.eup %1120 }
 0x303   : > { %1122 = vpow2.f32 %v591_v59  ;;  %609 = vadd.xlane.f32.xlu2 %v608_v10  ;;  %v390_v1 = vsel %vm338_vm1, %v1432_v62, 0.0 }
 0x306   : > { %v568_v60 = vpop.xlane.xlu1 %567 }
 0x307   : > { %v580_v61 = vsub.f32 %v1392_v20, %v568_v60 }
 0x309   : > { %v593_v63 = vmul.f32 1.442695, %v580_v61  ;;  %v1434_v0 = vpop.eup %1122 }
 0x30a   : > { %v611_v4 = vsel %vm338_vm1, %v1434_v0, 0.0 }
 0x30b   : > { %1124 = vpow2.f32 %v593_v63  ;;  %612 = vadd.xlane.f32.xlu1 %v611_v4  ;;  %391 = vadd.xlane.f32.xlu2 %v390_v1 }
 0x30e   : > { %v571_v3 = vpop.xlane.xlu2 %570 }
 0x30f   : > { %v581_v5 = vsub.f32 %v1396_v22, %v571_v3  ;;  %v365_v22 = vsub.f32 %v1352_v12, %v347_v16 }
 0x311   : > { %v1441_v6 = vpop.eup %1124  ;;  %v595_v7 = vmul.f32 1.442695, %v581_v5  ;;  %v375_v26 = vmul.f32 1.442695, %v365_v22 }
 0x312   : > { %v614_v8 = vsel %vm338_vm1, %v1441_v6, 0.0 }
 0x313   : > { %1126 = vpow2.f32 %v595_v7  ;;  %615 = vadd.xlane.f32.xlu2 %v614_v8 }
 0x316   : > { %v350_v11 = vpop.xlane.xlu2 %349  ;;  %v574_v14 = vpop.xlane.xlu1 %573 }
 0x317   : > { %v366_v17 = vsub.f32 %v1354_v13, %v350_v11  ;;  %v582_v18 = vsub.f32 %v1400_v24, %v574_v14 }
 0x319   : > { %v1449_v19 = vpop.eup %1126  ;;  %v377_v20 = vmul.f32 1.442695, %v366_v17  ;;  %v597_v21 = vmul.f32 1.442695, %v582_v18 }
 0x31a   : > { %v617_v23 = vsel %vm338_vm1, %v1449_v19, 0.0 }
 0x31b   : > { %1128 = vpow2.f32 %v377_v20  ;;  %618 = vadd.xlane.f32.xlu2 %v617_v23 }
 0x31c   : > { %1130 = vpow2.f32 %v597_v21 }
 0x31d   : > { %1132 = vpow2.f32 %v371_v25 }
 0x31e   : > { %1134 = vpow2.f32 %v375_v26 }
 0x321   : > { %v1454_v9 = vpop.eup %1128 }
 0x322   : > { %v1456_v13 = vpop.eup %1130  ;;  %v396_v24 = vsel %vm338_vm1, %v1454_v9, 0.0 }
 0x323   : > { %397 = vadd.xlane.f32.xlu1 %v396_v24  ;;  %v620_v12 = vsel %vm338_vm1, %v1456_v13, 0.0  ;;  %v1462_v27 = vpop.eup %1132 }
 0x324   : > { %621 = vadd.xlane.f32.xlu2 %v620_v12  ;;  %v1464_v28 = vpop.eup %1134  ;;  %v387_v29 = vsel %vm338_vm1, %v1462_v27, 0.0  ;;  %v1026_v12 = vld [vmem:[%s1581_s2 + $0x18] sm:$0xff] }
 0x325   : > { %v393_v30 = vsel %vm338_vm1, %v1464_v28, 0.0  ;;  %798 = vmatpush.bf16.msrb.mxu1 %v1026_v12 }
 0x329   : > { %388 = vadd.xlane.f32.xlu0 %v387_v29  ;;  %v1024_v29 = vld [vmem:[%s1581_s2 + $0x8] sm:$0xff] }
 0x32c   : > { %394 = vadd.xlane.f32.xlu2 %v393_v30  ;;  %v1023_v30 = vld [vmem:[%s1581_s2] sm:$0xff] }
 0x32e   : > { %v646_v31 = vpop.permute.xlu1 %645 }
 0x32f   : > { %v661_v32 = vand.u32 %v646_v31, %v1366_v36 }
 0x331   : > { %669 = vmatpush.bf16.msrb.mxu3 %v661_v32 }
 0x35e   : > { %v601_v33 = vpop.xlane.xlu0 %600 }
 0x366   : > { %v604_v35 = vpop.xlane.xlu2 %603 }
 0x367   : > { %1136 = vrcp.f32 %v604_v35 }
 0x368   : > { %1138 = vrcp.f32 %v601_v33 }
 0x36d   : > { %v1137_v37 = vpop.eup %1136 }
 0x36e   : > { %v1139_v38 = vpop.eup %1138  ;;  %v632_v2 = vmul.f32 %v1137_v37, %v1414_v41  ;;  %v607_v39 = vpop.xlane.xlu2 %606 }
 0x36f   : > { %v631_v40 = vmul.f32 %v1139_v38, %v1410_v34  ;;  %1140 = vrcp.f32 %v607_v39 }
 0x371   : > { %v644_v42 = vpop.permute.xlu0 %643  ;;  %v639_v43 = vpack.c.bf16 %v632_v2, %v631_v40 }
 0x372   : > { %670 = vmatpush.bf16.msrb.mxu3 %v644_v42 }
 0x375   : > { %986 = vmatmul.msk.bf16.vlgmr.msrb.gmra.mxu3 %vm338_vm1, %v639_v43  ;;  %v1141_v36 = vpop.eup %1140 }
 0x376   : > { %v610_v44 = vpop.xlane.xlu2 %609  ;;  %v633_v41 = vmul.f32 %v1141_v36, %v1419_v52 }
 0x377   : > { %1142 = vrcp.f32 %v610_v44 }
 0x37d   : > { %v1143_v45 = vpop.eup %1142 }
 0x37e   : > { %v479_v46 = vpop.f32.mrf.mxu3  ;;  %v392_v47 = vpop.xlane.xlu2 %391  ;;  %v634_v48 = vmul.f32 %v1143_v45, %v1427_v58 }
 0x37f   : > { %490 = vst.msk [vmem:[#allocation2 + $0x30] sm:$0xff] %vm290_vm0, %v479_v46  ;;  %v613_v34 = vpop.xlane.xlu1 %612 }
 0x380   : > { %v640_v49 = vpack.c.bf16 %v634_v48, %v633_v41  ;;  %1144 = vrcp.f32 %v613_v34  ;;  %v1095_v34 = vld [vmem:[%s1582_s3] ss:$0 sm:$0xff] }
 0x385   : > { %987 = vmatmul.msk.bf16.gmra.mxu3 %vm338_vm1, %v640_v49 }
 0x386   : > { %v481_v50 = vpop.f32.mrf.mxu3  ;;  %v616_v51 = vpop.xlane.xlu2 %615 }
 0x387   : > { %491 = vst.msk [vmem:[#allocation2 + $0x38] sm:$0xff] %vm290_vm0, %v481_v50  ;;  %1146 = vrcp.f32 %v616_v51  ;;  %v1145_v53 = vpop.eup %1144 }
 0x388   : > { %v635_v57 = vmul.f32 %v1145_v53, %v1434_v0 }
 0x38d   : > { %v1147_v54 = vpop.eup %1146 }
 0x38e   : > { %v619_v55 = vpop.xlane.xlu2 %618  ;;  %v636_v56 = vmul.f32 %v1147_v54, %v1441_v6 }
 0x38f   : > { %1148 = vrcp.f32 %v619_v55 }
 0x390   : > { %v641_v58 = vpack.c.bf16 %v636_v56, %v635_v57 }
 0x395   : > { %988 = vmatmul.msk.bf16.gmra.mxu3 %vm338_vm1, %v641_v58  ;;  %v1149_v60 = vpop.eup %1148 }
 0x396   : > { %v398_v59 = vpop.xlane.xlu1 %397  ;;  %v637_v0 = vmul.f32 %v1149_v60, %v1449_v19 }
 0x397   : > { %v622_v52 = vpop.xlane.xlu2 %621 }
 0x398   : > { %1150 = vrcp.f32 %v622_v52 }
 0x399   : > { %1152 = vrcp.f32 %v392_v47 }
 0x39c   : > { %v389_v10 = vpop.xlane.xlu0 %388 }
 0x39d   : > { %1154 = vrcp.f32 %v389_v10 }
 0x39e   : > { %v1151_v61 = vpop.eup %1150  ;;  %1156 = vrcp.f32 %v398_v59 }
 0x39f   : > { %v395_v63 = vpop.xlane.xlu2 %394  ;;  %v638_v4 = vmul.f32 %v1151_v61, %v1456_v13  ;;  %v1153_v1 = vpop.eup %1152 }
 0x3a0   : > { %1158 = vrcp.f32 %v395_v63  ;;  %v420_v7 = vmul.f32 %v1153_v1, %v1432_v62 }
 0x3a1   : > { %v642_v5 = vpack.c.bf16 %v638_v4, %v637_v0 }
 0x3a3   : > { %v1155_v3 = vpop.eup %1154 }
 0x3a4   : > { %v1157_v6 = vpop.eup %1156  ;;  %v419_v8 = vmul.f32 %v1155_v3, %v1462_v27  ;;  %v1025_v27 = vld [vmem:[%s1581_s2 + $0x10] sm:$0xff] }
 0x3a5   : > { %989 = vmatmul.msk.bf16.gmra.mxu3 %vm338_vm1, %v642_v5  ;;  %v422_v16 = vmul.f32 %v1157_v6, %v1454_v9  ;;  %799 = vmatpush.bf16.msrb.mxu1 %v1025_v27 }
 0x3a6   : > { %v1159_v11 = vpop.eup %1158  ;;  %v427_v14 = vpack.c.bf16 %v420_v7, %v419_v8 }
 0x3a7   : > { %v421_v15 = vmul.f32 %v1159_v11, %v1464_v28 }
 0x3a8   : > { %978 = vmatmul.msk.bf16.vlgmr.msrb.gmra.mxu0 %vm338_vm1, %v427_v14 }
 0x3a9   : > { %v428_v17 = vpack.c.bf16 %v422_v16, %v421_v15  ;;  %800 = vmatpush.bf16.msrb.mxu1 %v1024_v29 }
 0x3ab   : > { %979 = vmatmul.msk.bf16.vlgmr.msra.gmra.mxu1 %vm338_vm1, %v428_v17 }
 0x3ad   : > { %801 = vmatpush.bf16.msrb.mxu1 %v1023_v30 }
 0x3f8   : > { %v672_v18 = vpop.f32.mrf.mxu3 }
 0x3f9   : > { %700 = vrot.lane.b32.xlu2 %v672_v18, %s1243_s14 }
 0x400   : > { %v674_v19 = vpop.f32.mrf.mxu3 }
 0x401   : > { %702 = vrot.lane.b32.xlu0 %v674_v19, %s1243_s14 }
 0x408   : > { %v677_v62 = vpop.f32.mrf.mxu3 }
 0x409   : > { %704 = vrot.lane.b32.xlu1 %v677_v62, %s1243_s14 }
 0x410   : > { %v679_v20 = vpop.f32.mrf.mxu3 }
 0x411   : > { %706 = vrot.lane.b32.xlu0 %v679_v20, %s1243_s14 }
 0x418   : > { %v682_v21 = vpop.f32.mrf.mxu3 }
 0x419   : > { %708 = vrot.lane.b32.xlu2 %v682_v21, %s1243_s14 }
 0x420   : > { %v684_v22 = vpop.f32.mrf.mxu3 }
 0x421   : > { %710 = vrot.lane.b32.xlu1 %v684_v22, %s1243_s14 }
 0x425   : > { %v464_v23 = vpop.f32.mrf.mxu0 }
 0x426   : > { %484 = vst.msk [vmem:[#allocation2] sm:$0xff] %vm290_vm0, %v464_v23 }
 0x428   : > { %v469_v25 = vpop.f32.mrf.mxu1  ;;  %v687_v26 = vpop.f32.mrf.mxu3 }
 0x429   : > { %486 = vst.msk [vmem:[#allocation2 + $0x10] sm:$0xff] %vm290_vm0, %v469_v25  ;;  %712 = vrot.lane.b32.xlu0 %v687_v26, %s1243_s14 }
 0x42d   : > { %v466_v9 = vpop.f32.mrf.mxu0 }
 0x42e   : > { %485 = vst.msk [vmem:[#allocation2 + $0x8] sm:$0xff] %vm290_vm0, %v466_v9 }
 0x430   : > { %v471_v13 = vpop.f32.mrf.mxu1  ;;  %v689_v24 = vpop.f32.mrf.mxu3 }
 0x431   : > { %487 = vst.msk [vmem:[#allocation2 + $0x18] sm:$0xff] %vm290_vm0, %v471_v13  ;;  %714 = vrot.lane.b32.xlu2 %v689_v24, %s1243_s14 }
 0x453   : > { %v701_v28 = vpop.permute.xlu2 %700 }
 0x454   : > { %725 = vst.msk [vmem:[#allocation2] sm:$0xff] %vm724_vm4, %v701_v28 }
 0x45b   : > { %v733_v35 = vld [vmem:[#allocation2] sm:$0xff] }
 0x473   : > { %v703_v31 = vpop.permute.xlu0 %702  ;;  %v709_v32 = vpop.permute.xlu2 %708 }
 0x474   : > { %726 = vst.msk [vmem:[#allocation2 + $0x8] sm:$0xff] %vm724_vm4, %v703_v31 }
 0x475   : > { %729 = vst.msk [vmem:[#allocation2 + $0x20] sm:$0xff] %vm724_vm4, %v709_v32 }
 0x47b   : > { %v705_v33 = vpop.permute.xlu1 %704  ;;  %v734_v37 = vld [vmem:[#allocation2 + $0x8] sm:$0xff] }
 0x47c   : > { %727 = vst.msk [vmem:[#allocation2 + $0x10] sm:$0xff] %vm724_vm4, %v705_v33  ;;  %v741_v38 = vpack.c.bf16 %v734_v37, %v733_v35  ;;  %v737_v45 = vld [vmem:[#allocation2 + $0x20] sm:$0xff] }
 0x47e   : > { %1006 = vmatmul.msk.bf16.vlgmr.msrb.gmra.mxu1 %vm781_vm5, %v741_v38 }
 0x483   : > { %v707_v2 = vpop.permute.xlu0 %706  ;;  %v735_v40 = vld [vmem:[#allocation2 + $0x10] sm:$0xff] }
 0x484   : > { %728 = vst.msk [vmem:[#allocation2 + $0x18] sm:$0xff] %vm724_vm4, %v707_v2 }
 0x48b   : > { %v715_v39 = vpop.permute.xlu2 %714  ;;  %v736_v42 = vld [vmem:[#allocation2 + $0x18] sm:$0xff] }
 0x48c   : > { %732 = vst.msk [vmem:[#allocation2 + $0x38] sm:$0xff] %vm724_vm4, %v715_v39  ;;  %v742_v43 = vpack.c.bf16 %v736_v42, %v735_v40 }
 0x48e   : > { %1007 = vmatmul.msk.bf16.gmra.mxu1 %vm781_vm5, %v742_v43 }
 0x493   : > { %v711_v44 = vpop.permute.xlu1 %710  ;;  %v740_v41 = vld [vmem:[#allocation2 + $0x38] sm:$0xff] }
 0x494   : > { %730 = vst.msk [vmem:[#allocation2 + $0x28] sm:$0xff] %vm724_vm4, %v711_v44 }
 0x49b   : > { %v713_v36 = vpop.permute.xlu0 %712  ;;  %v738_v46 = vld [vmem:[#allocation2 + $0x28] sm:$0xff] }
 0x49c   : > { %731 = vst.msk [vmem:[#allocation2 + $0x30] sm:$0xff] %vm724_vm4, %v713_v36  ;;  %v743_v47 = vpack.c.bf16 %v738_v46, %v737_v45 }
 0x49e   : > { %1008 = vmatmul.msk.bf16.gmra.mxu1 %vm781_vm5, %v743_v47 }
 0x4a3   : > { %v739_v48 = vld [vmem:[#allocation2 + $0x30] sm:$0xff] }
 0x4a4   : > { %v744_v49 = vpack.c.bf16 %v740_v41, %v739_v48 }
 0x4ae   : > { %1009 = vmatmul.msk.bf16.gmra.mxu1 %vm781_vm5, %v744_v49 }
 0x4fb   : > { %v803_v50 = vpop.f32.mrf.mxu1 }
 0x4fc   : > { %v804_v51 = vadd.f32 %v1095_v34, %v803_v50 }
 0x4fe   : > { %823 = vst.msk [vmem:[%s230_s11] sm:$0xff] %vm781_vm5, %v804_v51 }
 0x503   : > { %v805_v53 = vpop.f32.mrf.mxu1 }
 0x504   : > { %v806_v54 = vadd.f32 %v1095_v34, %v805_v53 }
 0x506   : > { %824 = vst.msk [vmem:[%s230_s11 + $0x8] sm:$0xff] %vm781_vm5, %v806_v54 }
 0x50b   : > { %v808_v55 = vpop.f32.mrf.mxu1 }
 0x50c   : > { %v809_v56 = vadd.f32 %v1095_v34, %v808_v55 }
 0x50e   : > { %825 = vst.msk [vmem:[%s230_s11 + $0x10] sm:$0xff] %vm781_vm5, %v809_v56 }
 0x513   : > { %v810_v57 = vpop.f32.mrf.mxu1 }
 0x514   : > { %v811_v58 = vadd.f32 %v1095_v34, %v810_v57 }
 0x516   : > { %826 = vst.msk [vmem:[%s230_s11 + $0x18] sm:$0xff] %vm781_vm5, %v811_v58 }
 0x51b   : > { %v813_v52 = vpop.f32.mrf.mxu1 }
 0x51c   : > { %v814_v59 = vadd.f32 %v1095_v34, %v813_v52 }
 0x51e   : > { %827 = vst.msk [vmem:[%s230_s11 + $0x20] sm:$0xff] %vm781_vm5, %v814_v59 }
 0x523   : > { %v815_v10 = vpop.f32.mrf.mxu1 }
 0x524   : > { %v816_v60 = vadd.f32 %v1095_v34, %v815_v10 }
 0x526   : > { %828 = vst.msk [vmem:[%s230_s11 + $0x28] sm:$0xff] %vm781_vm5, %v816_v60 }
 0x52b   : > { %v818_v61 = vpop.f32.mrf.mxu1 }
 0x52c   : > { %v819_v63 = vadd.f32 %v1095_v34, %v818_v61 }
 0x52e   : > { %829 = vst.msk [vmem:[%s230_s11 + $0x30] sm:$0xff] %vm781_vm5, %v819_v63 }
 0x533   : > { %v820_v4 = vpop.f32.mrf.mxu1 }
 0x534   : > { %v821_v1 = vadd.f32 %v1095_v34, %v820_v4 }
 0x536   : > { %830 = vst.msk [vmem:[%s230_s11 + $0x38] sm:$0xff] %vm781_vm5, %v821_v1 }
 0x537   : > { %1187 = shalt.err (!%p1184_p5)
}
 0x538   : > { %s1244_s7 = smov 128   ;;  %s1245_s10 = smov 8  }
 0x539   : > { %1034 = dma.vmem_to_hbm [thread:$0]  (%p1311_p4), %s847_s22, 1024, %s849_s24, %s832_s26, %s1244_s7, %s1244_s7, %s1245_s10  }
 0x53a PF: > { %p1040_p6 = scmp.ge.s32.totalorder %s1238_s20, 2  ;;  %s863_s11 = sand.u32 1, %s1218_s15  }
 0x53b   : > { %s864_s12 = scalar_lea.sflag [#allocation4], %s863_s11 }
 0x53c   : > { %p1037_p7 = pnand %p1040_p6, %p1318_p8 }
 0x53e   : > { %p1038_p9 = pneg %p1037_p7 }
 0x540   : > { %1213 = dma.done.wait (%p1038_p9), %s864_s12, 1024  }
 0x541   : > { %1215 = vsyncadd (%p1038_p9), %s864_s12, 4294966272  ;;  %s17_s20 = sadd.s32 1, %s1238_s20   ;;  %s1586_s15 = smov %s1222_s16 }
 0x542   : > { %p14_p10 = scmp.ge.s32.totalorder %s17_s20, 4   ;;  %s1587_s16 = smov %s1226_s17 }
 0x543   : > { %s1588_s17 = smov %s1324_s28  ;;  %s1589_s18 = smov %s1234_s19 }
 0x544   : > { %s1590_s19 = smov %s1592_s23  ;;  %16 = sbr.rel (!%p14_p10) target bundleno = 4 (0x4), region = 74 }
 0x549   :  { %870 = vsyncpa [#allocation4], 1 }
 0x54a   :  { %872 = vsyncpa [#allocation4 + $0x1], 1 }

</bundles_post_ra>
